<compile_context>
chip_gen: v6e
topology: v6e:2x2x1
jax: 0.10.0
libtpu: 0.0.40
codegen_flags: <defaults>
</compile_context>

<pallas_src>
import math
import functools

import jax
import jax.numpy as jnp
from jax.experimental import pallas as pl
from jax.experimental.pallas import tpu as pltpu


# ----------------------------------------------------------------------------- helpers

_INV_SQRT2 = 0.7071067811865476


def _erf(z):
    # Abramowitz & Stegun 7.1.26 (|err| <= 1.5e-7); exp / reciprocal go to the EUP.
    a1, a2, a3, a4, a5 = 0.254829592, -0.284496736, 1.421413741, -1.453152027, 1.061405429
    p = 0.3275911
    sgn = jnp.where(z >= 0.0, 1.0, -1.0)
    az = jnp.abs(z)
    t = pl.reciprocal(1.0 + p * az, approx=True)
    poly = ((((a5 * t + a4) * t + a3) * t + a2) * t + a1) * t
    return sgn * (1.0 - poly * jnp.exp(-az * az))


def _gelu(x):
    # exact (erf) GELU, matching torch.nn.functional.gelu's default
    return 0.5 * x * (1.0 + _erf(x * _INV_SQRT2))


def _round_up(x, m):
    return ((x + m - 1) // m) * m


# ----------------------------------------------------------------------------- fused kernel

def _fused_kernel(x_ref, kmask_ref, rmask_ref, pe_ref, pw_ref, pb_ref,
                  wqkv_ref, bqkv_ref, wo_ref, bo_ref,
                  w1_ref, b1_ref, w2_ref, b2_ref,
                  n1s_ref, n1b_ref, n2s_ref, n2b_ref,
                  ow_ref, ob_ref,
                  y_ref, act_ref, heads_ref,
                  *, n_heads, head_dim, batch_tile, seq_pad):
    li = pl.program_id(1)                 # layer index ("arbitrary" axis)
    n_layers = pl.num_programs(1)
    H, hd, bt, Lp = n_heads, head_dim, batch_tile, seq_pad
    D = H * hd
    R = bt * Lp

    # ---- layer-0 prologue: input projection (sqrt(d_model) pre-folded) + pos-enc
    @pl.when(li == 0)
    def _():
        proj = jnp.dot(x_ref[0], pw_ref[...], preferred_element_type=jnp.float32)  # (R, D)
        proj = proj + pb_ref[...]
        proj = proj.reshape(bt, Lp, D) + pe_ref[...][None, :, :]
        act_ref[...] = proj.reshape(R, D)

    x = act_ref[...]                      # (R, D) fp32 resident activation
    x_bf = x.astype(jnp.bfloat16)
    kmask = kmask_ref[0]                  # (bt, Lp) additive key-padding mask (0 / -1e30)

    # ---- multi-head self-attention
    # fused full-width QKV projections (MXU N = D, 1/sqrt(hd) folded into Q)
    q = jnp.dot(x_bf, wqkv_ref[0, 0], preferred_element_type=jnp.float32) + bqkv_ref[0, 0]
    k = jnp.dot(x_bf, wqkv_ref[0, 1], preferred_element_type=jnp.float32) + bqkv_ref[0, 1]
    v = jnp.dot(x_bf, wqkv_ref[0, 2], preferred_element_type=jnp.float32) + bqkv_ref[0, 2]

    # per-head scores / softmax / PV, batched over the batch-slot axis (no
    # cross-batch scores); head outputs packed into the (R, D) scratch slab.
    for h in range(H):
        sl = slice(h * hd, (h + 1) * hd)
        qh = q[:, sl].reshape(bt, Lp, hd).astype(jnp.bfloat16)
        kh = k[:, sl].reshape(bt, Lp, hd).astype(jnp.bfloat16)
        vh = v[:, sl].reshape(bt, Lp, hd).astype(jnp.bfloat16)
        s = jnp.einsum('bqd,bkd->bqk', qh, kh,
                       preferred_element_type=jnp.float32)          # (bt, Lp, Lp)
        s = s + kmask[:, None, :]                                    # key padding only
        m = jnp.max(s, axis=-1, keepdims=True)
        e = jnp.exp(s - m)
        p = e * pl.reciprocal(jnp.sum(e, axis=-1, keepdims=True), approx=True)
        o = jnp.einsum('bqk,bkd->bqd', p.astype(jnp.bfloat16), vh,
                       preferred_element_type=jnp.float32)           # (bt, Lp, hd)
        heads_ref[:, sl] = o.reshape(R, hd)

    # single full-width output projection
    attn = jnp.dot(heads_ref[...].astype(jnp.bfloat16), wo_ref[0],
                   preferred_element_type=jnp.float32) + bo_ref[0]

    # residual + BatchNorm1 (eval running stats folded to scale/shift)
    src = x + attn
    src = src * n1s_ref[0] + n1b_ref[0]

    # feed-forward (exact-erf gelu) + residual + BatchNorm2
    h1 = jnp.dot(src.astype(jnp.bfloat16), w1_ref[0],
                 preferred_element_type=jnp.float32) + b1_ref[0]
    h1 = _gelu(h1)
    h2 = jnp.dot(h1.astype(jnp.bfloat16), w2_ref[0],
                 preferred_element_type=jnp.float32) + b2_ref[0]
    src = src + h2
    src = src * n2s_ref[0] + n2b_ref[0]
    act_ref[...] = src

    # ---- last-layer epilogue: gelu, padding mask, Linear(d_model, 1)
    @pl.when(li == n_layers - 1)
    def _():
        xg = _gelu(src) * rmask_ref[0]                               # (R, D)
        y_ref[0] = jnp.sum(xg * ow_ref[...], axis=-1, keepdims=True) + ob_ref[...]


# ----------------------------------------------------------------------------- pallas_call wrapper

def _vmem_limit_bytes(R, bt, Lp, D, dff, F):
    # double-buffered per-layer weight stream (bf16 weights, fp32 biases/BN)
    w_layer = 2 * (3 * D * D + D * D + D * dff + dff * D) + 4 * (3 * D + D + dff + D + 4 * D)
    streamed = 2 * w_layer
    consts = 4 * Lp * D + 2 * F * D + 8 * D + 4                      # pe, proj_w/b, out_w/b
    per_tile = 2 * (2 * R * F + 4 * bt * Lp + 4 * R + 4 * R)         # x, kmask, rmask, y
    scratch = 2 * 4 * R * D                                          # act + heads slabs
    temps = 4 * R * 3 * D + 4 * bt * Lp * Lp + 4 * R * dff           # q/k/v, scores, FF hidden
    est = streamed + consts + per_tile + scratch + temps
    return int(min(64 * 1024 * 1024, max(32 * 1024 * 1024, 1.25 * est + (2 << 20))))


def _fused_pallas_forward(kp, x_t, kmask, rmask, pe, bt, Lp):
    n_bt, R, F = x_t.shape
    D = kp["d_model"]
    H = kp["n_heads"]
    NL = kp["num_layers"]
    dff = kp["dff"]
    hd = D // H

    c2 = lambda b, l: (0, 0)            # constants fetched once
    bt3 = lambda b, l: (b, 0, 0)        # per-batch-tile activations / masks
    lw3 = lambda b, l: (l, 0, 0)        # layer-streamed 3-D weights
    lw4 = lambda b, l: (l, 0, 0, 0)     # layer-streamed 4-D weights

    kernel = functools.partial(_fused_kernel, n_heads=H, head_dim=hd,
                               batch_tile=bt, seq_pad=Lp)
    return pl.pallas_call(
        kernel,
        out_shape=jax.ShapeDtypeStruct((n_bt, R, 1), jnp.float32),
        grid=(n_bt, NL),
        in_specs=[
            pl.BlockSpec((1, R, F), bt3),        # input rows (bf16)
            pl.BlockSpec((1, bt, Lp), bt3),      # additive key-padding mask (fp32)
            pl.BlockSpec((1, R, 1), bt3),        # multiplicative row mask for the head
            pl.BlockSpec((Lp, D), c2),           # positional encoding (single slab)
            pl.BlockSpec((F, D), c2),            # proj_w (bf16, sqrt(d_model) folded)
            pl.BlockSpec((1, D), c2),            # proj_b
            pl.BlockSpec((1, 3, D, D), lw4),     # packed wq/wk/wv (1/sqrt(hd) folded into Q)
            pl.BlockSpec((1, 3, 1, D), lw4),     # packed bq/bk/bv
            pl.BlockSpec((1, D, D), lw3),        # wo
            pl.BlockSpec((1, 1, D), lw3),        # bo
            pl.BlockSpec((1, D, dff), lw3),      # w1
            pl.BlockSpec((1, 1, dff), lw3),      # b1
            pl.BlockSpec((1, dff, D), lw3),      # w2
            pl.BlockSpec((1, 1, D), lw3),        # b2
            pl.BlockSpec((1, 1, D), lw3),        # bn1 scale
            pl.BlockSpec((1, 1, D), lw3),        # bn1 shift
            pl.BlockSpec((1, 1, D), lw3),        # bn2 scale
            pl.BlockSpec((1, 1, D), lw3),        # bn2 shift
            pl.BlockSpec((1, D), c2),            # out_w
            pl.BlockSpec((1, 1), c2),            # out_b
        ],
        out_specs=pl.BlockSpec((1, R, 1), bt3),
        scratch_shapes=[pltpu.VMEM((R, D), jnp.float32),   # resident activation
                        pltpu.VMEM((R, D), jnp.float32)],  # packed head outputs
        compiler_params=pltpu.CompilerParams(
            dimension_semantics=("parallel", "arbitrary"),
            vmem_limit_bytes=_vmem_limit_bytes(R, bt, Lp, D, dff, F)),
    )(x_t, kmask, rmask, pe,
      kp["proj_w"], kp["proj_b"], kp["wqkv"], kp["bqkv"], kp["wo"], kp["bo"],
      kp["w1"], kp["b1"], kp["w2"], kp["b2"],
      kp["n1s"], kp["n1b"], kp["n2s"], kp["n2b"],
      kp["out_w"], kp["out_b"])


# ----------------------------------------------------------------------------- parameters

def init_params(key, feat_dim, d_model, n_heads, num_layers, dim_feedforward, max_len):
    """Random parameters in a PyTorch-like layout."""
    ks = jax.random.split(key, 5 + num_layers)

    def rnd(k, shape, s=0.1):
        return (s * jax.random.normal(k, shape)).astype(jnp.float32)

    params = {"n_heads": n_heads, "d_model": d_model, "max_len": max_len}
    params["time_emb"] = rnd(ks[0], (1000, feat_dim))        # nn.Embedding(1000, feat_dim)
    params["proj_w"] = rnd(ks[1], (feat_dim, d_model))       # Linear(feat_dim, d_model), x @ W
    params["proj_b"] = rnd(ks[2], (d_model,))
    params["out_w"] = rnd(ks[3], (d_model,))                 # Linear(d_model, 1)
    params["out_b"] = rnd(ks[4], (1,))

    # fixed sinusoidal positional encoding buffer
    pos = jnp.arange(max_len, dtype=jnp.float32)[:, None]
    div = jnp.exp(jnp.arange(0, d_model, 2, dtype=jnp.float32) * (-math.log(10000.0) / d_model))
    pe = jnp.zeros((max_len, d_model), jnp.float32)
    pe = pe.at[:, 0::2].set(jnp.sin(pos * div))
    pe = pe.at[:, 1::2].set(jnp.cos(pos * div))
    params["pe"] = pe

    layers = []
    for li in range(num_layers):
        lk = jax.random.split(ks[5 + li], 20)
        layers.append({
            "wq": rnd(lk[0], (d_model, d_model)), "bq": rnd(lk[1], (d_model,)),
            "wk": rnd(lk[2], (d_model, d_model)), "bk": rnd(lk[3], (d_model,)),
            "wv": rnd(lk[4], (d_model, d_model)), "bv": rnd(lk[5], (d_model,)),
            "wo": rnd(lk[6], (d_model, d_model)), "bo": rnd(lk[7], (d_model,)),
            "w1": rnd(lk[8], (d_model, dim_feedforward)), "b1": rnd(lk[9], (dim_feedforward,)),
            "w2": rnd(lk[10], (dim_feedforward, d_model)), "b2": rnd(lk[11], (d_model,)),
            "bn1_g": 1.0 + rnd(lk[12], (d_model,)), "bn1_b": rnd(lk[13], (d_model,)),
            "bn1_m": rnd(lk[14], (d_model,)), "bn1_v": 1.0 + jnp.abs(rnd(lk[15], (d_model,))),
            "bn2_g": 1.0 + rnd(lk[16], (d_model,)), "bn2_b": rnd(lk[17], (d_model,)),
            "bn2_m": rnd(lk[18], (d_model,)), "bn2_v": 1.0 + jnp.abs(rnd(lk[19], (d_model,))),
        })
    params["layers"] = layers
    return params


def pack_params(params):
    """Host-side glue: QKV packing, bf16 casts, BN (eval) folding, scale folding."""
    D = params["d_model"]
    H = params["n_heads"]
    hd = D // H
    L = params["layers"]
    NL = len(L)
    dff = L[0]["w1"].shape[1]
    sqrt_d = math.sqrt(D)
    qk = 1.0 / math.sqrt(hd)
    eps = 1e-5

    def bn_fold(g, b, m, v):
        s = g / jnp.sqrt(v + eps)
        return s.reshape(1, D), (b - m * s).reshape(1, D)

    n1 = [bn_fold(lp["bn1_g"], lp["bn1_b"], lp["bn1_m"], lp["bn1_v"]) for lp in L]
    n2 = [bn_fold(lp["bn2_g"], lp["bn2_b"], lp["bn2_m"], lp["bn2_v"]) for lp in L]

    wqkv = jnp.stack([jnp.stack([lp["wq"] * qk, lp["wk"], lp["wv"]]) for lp in L])   # (NL,3,D,D)
    bqkv = jnp.stack([jnp.stack([(lp["bq"] * qk).reshape(1, D),
                                 lp["bk"].reshape(1, D),
                                 lp["bv"].reshape(1, D)]) for lp in L])              # (NL,3,1,D)

    return dict(
        d_model=D, n_heads=H, num_layers=NL, dff=dff, max_len=params["max_len"],
        time_emb=params["time_emb"], pe=params["pe"],
        proj_w=(params["proj_w"] * sqrt_d).astype(jnp.bfloat16),
        proj_b=(params["proj_b"] * sqrt_d).reshape(1, D).astype(jnp.float32),
        out_w=params["out_w"].reshape(1, D).astype(jnp.float32),
        out_b=params["out_b"].reshape(1, 1).astype(jnp.float32),
        wqkv=wqkv.astype(jnp.bfloat16),
        bqkv=bqkv.astype(jnp.float32),
        wo=jnp.stack([lp["wo"] for lp in L]).astype(jnp.bfloat16),
        bo=jnp.stack([lp["bo"].reshape(1, D) for lp in L]).astype(jnp.float32),
        w1=jnp.stack([lp["w1"] for lp in L]).astype(jnp.bfloat16),
        b1=jnp.stack([lp["b1"].reshape(1, dff) for lp in L]).astype(jnp.float32),
        w2=jnp.stack([lp["w2"] for lp in L]).astype(jnp.bfloat16),
        b2=jnp.stack([lp["b2"].reshape(1, D) for lp in L]).astype(jnp.float32),
        n1s=jnp.stack([a for a, _ in n1]), n1b=jnp.stack([b for _, b in n1]),
        n2s=jnp.stack([a for a, _ in n2]), n2b=jnp.stack([b for _, b in n2]),
    )


# ----------------------------------------------------------------------------- forward

def forward(packed, X, t, padding_masks, *, batch_tile=None):
    """X: (B, S, feat_dim), t: () or (B,) int, padding_masks: (B, S+1) bool (True = keep)."""
    B, S, F = X.shape
    D = packed["d_model"]
    dff = packed["dff"]
    L = S + 1                                          # time-step token appended
    assert L <= packed["max_len"]
    # pad the sequence to a sublane multiple (lane-dense 128 once long enough to matter)
    Lp = _round_up(L, 128) if L > 64 else _round_up(L, 8)

    t = jnp.asarray(t, jnp.int32)
    if t.ndim == 0:
        t = jnp.full((B,), t, dtype=jnp.int32)
    # TODO(synk): data-dependent embedding-table row gather kept in plain JAX (glue).
    t_emb = packed["time_emb"][t]                                        # (B, F)
    x_ext = jnp.concatenate([X, t_emb[:, None, :]], axis=1)              # (B, L, F)

    # batch tiling: cap rows per tile by a VMEM row budget (v7x 64 MiB aware),
    # force an even number (>=2) of batch tiles so both v7x TensorCores get work.
    if batch_tile is None:
        per_row = 8 * D + 4 * dff + 4 * Lp + 2 * F + 12 * D              # rough bytes/row resident
        bt_cap = max(1, (24 * 1024 * 1024) // (per_row * Lp))
        batch_tile = max(1, min(bt_cap, (B + 1) // 2))
    n_bt = -(-B // batch_tile)
    if n_bt % 2:
        n_bt += 1
    B_pad = n_bt * batch_tile
    R = batch_tile * Lp

    x_pad = jnp.zeros((B_pad, Lp, F), jnp.bfloat16).at[:B, :L, :].set(x_ext.astype(jnp.bfloat16))
    x_t = x_pad.reshape(n_bt, R, F)

    pe = jnp.zeros((Lp, D), jnp.float32).at[:L].set(packed["pe"][:L])

    keep = jnp.zeros((B_pad, Lp), dtype=bool).at[:B, :L].set(padding_masks)
    kmask = jnp.where(keep, 0.0, -1e30).astype(jnp.float32).reshape(n_bt, batch_tile, Lp)
    rmask = keep.astype(jnp.float32).reshape(n_bt, R)[..., None]         # (n_bt, R, 1)

    y = _fused_pallas_forward(packed, x_t, kmask, rmask, pe, batch_tile, Lp)   # (n_bt, R, 1)
    return y.reshape(B_pad, Lp)[:B, :S]                                  # drop time token + padding


# ----------------------------------------------------------------------------- main

if __name__ == "__main__":
    B, S, FEAT, D_MODEL, N_HEADS, N_LAYERS, DFF = 2, 8, 8, 32, 4, 2, 64
    MAX_LEN = 16

    key = jax.random.PRNGKey(0)
    kp_key, kx = jax.random.split(key)
    params = init_params(kp_key, FEAT, D_MODEL, N_HEADS, N_LAYERS, DFF, MAX_LEN)
    packed = pack_params(params)

    X = jax.random.normal(kx, (B, S, FEAT), dtype=jnp.float32)
    t = jnp.array([3, 17], dtype=jnp.int32)
    padding_masks = jnp.ones((B, S + 1), dtype=bool).at[1, 7].set(False)

    fwd = jax.jit(lambda X, t, pm: forward(packed, X, t, pm))
    out = fwd(X, t, padding_masks)
    out = jax.block_until_ready(out)

    assert out.shape == (B, S), out.shape
    assert bool(jnp.all(jnp.isfinite(out)))
    print("KERNEL_OK")
</pallas_src>

<mosaic_0001>
module attributes {stable_mosaic.version = 11 : i64} {
  func.func @_fused_kernel(%arg0: i32, %arg1: i32, %arg2: memref<1x16x8xbf16, #tpu.memory_space<vmem>>, %arg3: memref<1x1x16xf32, #tpu.memory_space<vmem>>, %arg4: memref<1x16x1xf32, #tpu.memory_space<vmem>>, %arg5: memref<16x32xf32, #tpu.memory_space<vmem>>, %arg6: memref<8x32xbf16, #tpu.memory_space<vmem>>, %arg7: memref<1x32xf32, #tpu.memory_space<vmem>>, %arg8: memref<1x3x32x32xbf16, #tpu.memory_space<vmem>>, %arg9: memref<1x3x1x32xf32, #tpu.memory_space<vmem>>, %arg10: memref<1x32x32xbf16, #tpu.memory_space<vmem>>, %arg11: memref<1x1x32xf32, #tpu.memory_space<vmem>>, %arg12: memref<1x32x64xbf16, #tpu.memory_space<vmem>>, %arg13: memref<1x1x64xf32, #tpu.memory_space<vmem>>, %arg14: memref<1x64x32xbf16, #tpu.memory_space<vmem>>, %arg15: memref<1x1x32xf32, #tpu.memory_space<vmem>>, %arg16: memref<1x1x32xf32, #tpu.memory_space<vmem>>, %arg17: memref<1x1x32xf32, #tpu.memory_space<vmem>>, %arg18: memref<1x1x32xf32, #tpu.memory_space<vmem>>, %arg19: memref<1x1x32xf32, #tpu.memory_space<vmem>>, %arg20: memref<1x32xf32, #tpu.memory_space<vmem>>, %arg21: memref<1x1xf32, #tpu.memory_space<vmem>>, %arg22: memref<1x16x1xf32, #tpu.memory_space<vmem>>, %arg23: memref<16x32xf32, #tpu.memory_space<vmem>>, %arg24: memref<16x32xf32, #tpu.memory_space<vmem>>) attributes {dimension_semantics = [#tpu.dimension_semantics<parallel>, #tpu.dimension_semantics<arbitrary>], iteration_bounds = array<i64: 2, 2>, scalar_prefetch = 0 : i64, scratch_operands = 2 : i64, tpu.core_type = #tpu.core_type<tc>, window_params = [{transform_indices = @transform_0, window_bounds = array<i64: 1, 16, 8>}, {transform_indices = @transform_1, window_bounds = array<i64: 1, 1, 16>}, {transform_indices = @transform_2, window_bounds = array<i64: 1, 16, 1>}, {pipeline_mode = #tpu.pipeline_mode<synchronous>, transform_indices = @transform_3, window_bounds = array<i64: 16, 32>}, {pipeline_mode = #tpu.pipeline_mode<synchronous>, transform_indices = @transform_4, window_bounds = array<i64: 8, 32>}, {pipeline_mode = #tpu.pipeline_mode<synchronous>, transform_indices = @transform_5, window_bounds = array<i64: 1, 32>}, {transform_indices = @transform_6, window_bounds = array<i64: 1, 3, 32, 32>}, {transform_indices = @transform_7, window_bounds = array<i64: 1, 3, 1, 32>}, {transform_indices = @transform_8, window_bounds = array<i64: 1, 32, 32>}, {transform_indices = @transform_9, window_bounds = array<i64: 1, 1, 32>}, {transform_indices = @transform_10, window_bounds = array<i64: 1, 32, 64>}, {transform_indices = @transform_11, window_bounds = array<i64: 1, 1, 64>}, {transform_indices = @transform_12, window_bounds = array<i64: 1, 64, 32>}, {transform_indices = @transform_13, window_bounds = array<i64: 1, 1, 32>}, {transform_indices = @transform_14, window_bounds = array<i64: 1, 1, 32>}, {transform_indices = @transform_15, window_bounds = array<i64: 1, 1, 32>}, {transform_indices = @transform_16, window_bounds = array<i64: 1, 1, 32>}, {transform_indices = @transform_17, window_bounds = array<i64: 1, 1, 32>}, {pipeline_mode = #tpu.pipeline_mode<synchronous>, transform_indices = @transform_18, window_bounds = array<i64: 1, 32>}, {pipeline_mode = #tpu.pipeline_mode<synchronous>, transform_indices = @transform_19, window_bounds = array<i64: 1, 1>}, {transform_indices = @transform_20, window_bounds = array<i64: 1, 16, 1>}]} {
    %c0_i32 = arith.constant 0 : i32
    %0 = arith.cmpi eq, %arg1, %c0_i32 : i32
    %1 = arith.extui %0 : i1 to i32
    %c0_i32_0 = arith.constant 0 : i32
    %2 = arith.cmpi ne, %1, %c0_i32_0 : i32
    scf.if %2 {
      %c0_103 = arith.constant 0 : index
      %c0_104 = arith.constant 0 : index
      %c0_105 = arith.constant 0 : index
      %223 = vector.load %arg2[%c0_103, %c0_104, %c0_105] : memref<1x16x8xbf16, #tpu.memory_space<vmem>>, vector<1x16x8xbf16>
      %224 = vector.shape_cast %223 : vector<1x16x8xbf16> to vector<16x8xbf16>
      %c0_106 = arith.constant 0 : index
      %c0_107 = arith.constant 0 : index
      %225 = vector.load %arg6[%c0_106, %c0_107] : memref<8x32xbf16, #tpu.memory_space<vmem>>, vector<8x32xbf16>
      %cst_108 = arith.constant dense<0.000000e+00> : vector<16x32xf32>
      %226 = tpu.matmul %224, %225, %cst_108 {dimension_numbers = #tpu.dot_dimension_numbers<[1], [0], [0], [1], [0, 0, 1, 1], [], []>} : vector<16x8xbf16>, vector<8x32xbf16>, vector<16x32xf32> -> vector<16x32xf32>
      %c0_109 = arith.constant 0 : index
      %c0_110 = arith.constant 0 : index
      %227 = vector.load %arg7[%c0_109, %c0_110] : memref<1x32xf32, #tpu.memory_space<vmem>>, vector<1x32xf32>
      %228 = vector.broadcast %227 : vector<1x32xf32> to vector<16x32xf32>
      %229 = arith.addf %226, %228 : vector<16x32xf32>
      %230 = vector.shape_cast %229 : vector<16x32xf32> to vector<1x16x32xf32>
      %c0_111 = arith.constant 0 : index
      %c0_112 = arith.constant 0 : index
      %231 = vector.load %arg5[%c0_111, %c0_112] : memref<16x32xf32, #tpu.memory_space<vmem>>, vector<16x32xf32>
      %232 = vector.shape_cast %231 : vector<16x32xf32> to vector<1x16x32xf32>
      %233 = arith.addf %230, %232 : vector<1x16x32xf32>
      %234 = vector.shape_cast %233 : vector<1x16x32xf32> to vector<16x32xf32>
      %c0_113 = arith.constant 0 : index
      %c0_114 = arith.constant 0 : index
      %235 = vector.load %arg23[%c0_113, %c0_114] : memref<16x32xf32, #tpu.memory_space<vmem>>, vector<16x32xf32>
      tpu.vector_store %arg23[%c0_113, %c0_114], %234 {strides = array<i32>} : memref<16x32xf32, #tpu.memory_space<vmem>>, vector<16x32xf32>,
    } else {
    }
    %c0 = arith.constant 0 : index
    %c0_1 = arith.constant 0 : index
    %3 = vector.load %arg23[%c0, %c0_1] : memref<16x32xf32, #tpu.memory_space<vmem>>, vector<16x32xf32>
    %4 = arith.truncf %3 : vector<16x32xf32> to vector<16x32xbf16>
    %c0_2 = arith.constant 0 : index
    %c0_3 = arith.constant 0 : index
    %c0_4 = arith.constant 0 : index
    %5 = vector.load %arg3[%c0_2, %c0_3, %c0_4] : memref<1x1x16xf32, #tpu.memory_space<vmem>>, vector<1x1x16xf32>
    %6 = vector.shape_cast %5 : vector<1x1x16xf32> to vector<1x16xf32>
    %c0_5 = arith.constant 0 : index
    %c0_6 = arith.constant 0 : index
    %c0_7 = arith.constant 0 : index
    %c0_8 = arith.constant 0 : index
    %7 = vector.load %arg8[%c0_5, %c0_6, %c0_7, %c0_8] : memref<1x3x32x32xbf16, #tpu.memory_space<vmem>>, vector<1x1x32x32xbf16>
    %8 = vector.shape_cast %7 : vector<1x1x32x32xbf16> to vector<32x32xbf16>
    %cst = arith.constant dense<0.000000e+00> : vector<16x32xf32>
    %9 = tpu.matmul %4, %8, %cst {dimension_numbers = #tpu.dot_dimension_numbers<[1], [0], [0], [1], [0, 0, 1, 1], [], []>} : vector<16x32xbf16>, vector<32x32xbf16>, vector<16x32xf32> -> vector<16x32xf32>
    %c0_9 = arith.constant 0 : index
    %c0_10 = arith.constant 0 : index
    %c0_11 = arith.constant 0 : index
    %c0_12 = arith.constant 0 : index
    %10 = vector.load %arg9[%c0_9, %c0_10, %c0_11, %c0_12] : memref<1x3x1x32xf32, #tpu.memory_space<vmem>>, vector<1x1x1x32xf32>
    %11 = vector.shape_cast %10 : vector<1x1x1x32xf32> to vector<1x32xf32>
    %12 = vector.broadcast %11 : vector<1x32xf32> to vector<16x32xf32>
    %13 = arith.addf %9, %12 : vector<16x32xf32>
    %c0_13 = arith.constant 0 : index
    %c1 = arith.constant 1 : index
    %c0_14 = arith.constant 0 : index
    %c0_15 = arith.constant 0 : index
    %14 = vector.load %arg8[%c0_13, %c1, %c0_14, %c0_15] : memref<1x3x32x32xbf16, #tpu.memory_space<vmem>>, vector<1x1x32x32xbf16>
    %15 = vector.shape_cast %14 : vector<1x1x32x32xbf16> to vector<32x32xbf16>
    %cst_16 = arith.constant dense<0.000000e+00> : vector<16x32xf32>
    %16 = tpu.matmul %4, %15, %cst_16 {dimension_numbers = #tpu.dot_dimension_numbers<[1], [0], [0], [1], [0, 0, 1, 1], [], []>} : vector<16x32xbf16>, vector<32x32xbf16>, vector<16x32xf32> -> vector<16x32xf32>
    %c0_17 = arith.constant 0 : index
    %c1_18 = arith.constant 1 : index
    %c0_19 = arith.constant 0 : index
    %c0_20 = arith.constant 0 : index
    %17 = vector.load %arg9[%c0_17, %c1_18, %c0_19, %c0_20] : memref<1x3x1x32xf32, #tpu.memory_space<vmem>>, vector<1x1x1x32xf32>
    %18 = vector.shape_cast %17 : vector<1x1x1x32xf32> to vector<1x32xf32>
    %19 = vector.broadcast %18 : vector<1x32xf32> to vector<16x32xf32>
    %20 = arith.addf %16, %19 : vector<16x32xf32>
    %c0_21 = arith.constant 0 : index
    %c2 = arith.constant 2 : index
    %c0_22 = arith.constant 0 : index
    %c0_23 = arith.constant 0 : index
    %21 = vector.load %arg8[%c0_21, %c2, %c0_22, %c0_23] : memref<1x3x32x32xbf16, #tpu.memory_space<vmem>>, vector<1x1x32x32xbf16>
    %22 = vector.shape_cast %21 : vector<1x1x32x32xbf16> to vector<32x32xbf16>
    %cst_24 = arith.constant dense<0.000000e+00> : vector<16x32xf32>
    %23 = tpu.matmul %4, %22, %cst_24 {dimension_numbers = #tpu.dot_dimension_numbers<[1], [0], [0], [1], [0, 0, 1, 1], [], []>} : vector<16x32xbf16>, vector<32x32xbf16>, vector<16x32xf32> -> vector<16x32xf32>
    %c0_25 = arith.constant 0 : index
    %c2_26 = arith.constant 2 : index
    %c0_27 = arith.constant 0 : index
    %c0_28 = arith.constant 0 : index
    %24 = vector.load %arg9[%c0_25, %c2_26, %c0_27, %c0_28] : memref<1x3x1x32xf32, #tpu.memory_space<vmem>>, vector<1x1x1x32xf32>
    %25 = vector.shape_cast %24 : vector<1x1x1x32xf32> to vector<1x32xf32>
    %26 = vector.broadcast %25 : vector<1x32xf32> to vector<16x32xf32>
    %27 = arith.addf %23, %26 : vector<16x32xf32>
    %28 = vector.extract_strided_slice %13 {offsets = [0, 0], sizes = [16, 8], strides = [1, 1]} : vector<16x32xf32> to vector<16x8xf32>
    %29 = vector.shape_cast %28 : vector<16x8xf32> to vector<1x16x8xf32>
    %30 = arith.truncf %29 : vector<1x16x8xf32> to vector<1x16x8xbf16>
    %31 = vector.extract_strided_slice %20 {offsets = [0, 0], sizes = [16, 8], strides = [1, 1]} : vector<16x32xf32> to vector<16x8xf32>
    %32 = vector.shape_cast %31 : vector<16x8xf32> to vector<1x16x8xf32>
    %33 = arith.truncf %32 : vector<1x16x8xf32> to vector<1x16x8xbf16>
    %34 = vector.extract_strided_slice %27 {offsets = [0, 0], sizes = [16, 8], strides = [1, 1]} : vector<16x32xf32> to vector<16x8xf32>
    %35 = vector.shape_cast %34 : vector<16x8xf32> to vector<1x16x8xf32>
    %36 = arith.truncf %35 : vector<1x16x8xf32> to vector<1x16x8xbf16>
    "tpu.trace_start"() <{level = 10 : i32, message = "bqd,bkd->bqk"}> : () -> ()
    %cst_29 = arith.constant dense<0.000000e+00> : vector<1x16x16xf32>
    %37 = tpu.matmul %30, %33, %cst_29 {dimension_numbers = #tpu.dot_dimension_numbers<[2], [2], [1], [1], [0, 0, 0, 1, 1, 1], [0], [0]>} : vector<1x16x8xbf16>, vector<1x16x8xbf16>, vector<1x16x16xf32> -> vector<1x16x16xf32>
    "tpu.trace_stop"() : () -> ()
    %38 = vector.shape_cast %6 : vector<1x16xf32> to vector<1x1x16xf32>
    %39 = vector.broadcast %38 : vector<1x1x16xf32> to vector<1x16x16xf32>
    %40 = arith.addf %37, %39 : vector<1x16x16xf32>
    %cst_30 = arith.constant dense<0xFF800000> : vector<1x16xf32>
    %41 = vector.multi_reduction <maximumf>, %40, %cst_30 [2] : vector<1x16x16xf32> to vector<1x16xf32>
    %42 = vector.shape_cast %41 : vector<1x16xf32> to vector<1x16x1xf32>
    %43 = vector.broadcast %42 : vector<1x16x1xf32> to vector<1x16x16xf32>
    %44 = arith.subf %40, %43 : vector<1x16x16xf32>
    %45 = math.exp %44 : vector<1x16x16xf32>
    %cst_31 = arith.constant dense<0.000000e+00> : vector<1x16xf32>
    %46 = vector.multi_reduction <add>, %45, %cst_31 [2] : vector<1x16x16xf32> to vector<1x16xf32>
    %47 = vector.shape_cast %46 : vector<1x16xf32> to vector<1x16x1xf32>
    %48 = tpu.reciprocal %47 {approx = true} : vector<1x16x1xf32> -> vector<1x16x1xf32>
    %49 = vector.broadcast %48 : vector<1x16x1xf32> to vector<1x16x16xf32>
    %50 = arith.mulf %45, %49 : vector<1x16x16xf32>
    %51 = arith.truncf %50 : vector<1x16x16xf32> to vector<1x16x16xbf16>
    "tpu.trace_start"() <{level = 10 : i32, message = "bqk,bkd->bqd"}> : () -> ()
    %cst_32 = arith.constant dense<0.000000e+00> : vector<1x16x8xf32>
    %52 = tpu.matmul %51, %36, %cst_32 {dimension_numbers = #tpu.dot_dimension_numbers<[2], [1], [1], [2], [0, 0, 0, 1, 1, 2], [0], [0]>} : vector<1x16x16xbf16>, vector<1x16x8xbf16>, vector<1x16x8xf32> -> vector<1x16x8xf32>
    "tpu.trace_stop"() : () -> ()
    %53 = vector.shape_cast %52 : vector<1x16x8xf32> to vector<16x8xf32>
    %c0_33 = arith.constant 0 : index
    %c0_34 = arith.constant 0 : index
    %54 = vector.load %arg24[%c0_33, %c0_34] : memref<16x32xf32, #tpu.memory_space<vmem>>, vector<16x8xf32>
    tpu.vector_store %arg24[%c0_33, %c0_34], %53 {strides = array<i32>} : memref<16x32xf32, #tpu.memory_space<vmem>>, vector<16x8xf32>,
    %55 = vector.extract_strided_slice %13 {offsets = [0, 8], sizes = [16, 8], strides = [1, 1]} : vector<16x32xf32> to vector<16x8xf32>
    %56 = vector.shape_cast %55 : vector<16x8xf32> to vector<1x16x8xf32>
    %57 = arith.truncf %56 : vector<1x16x8xf32> to vector<1x16x8xbf16>
    %58 = vector.extract_strided_slice %20 {offsets = [0, 8], sizes = [16, 8], strides = [1, 1]} : vector<16x32xf32> to vector<16x8xf32>
    %59 = vector.shape_cast %58 : vector<16x8xf32> to vector<1x16x8xf32>
    %60 = arith.truncf %59 : vector<1x16x8xf32> to vector<1x16x8xbf16>
    %61 = vector.extract_strided_slice %27 {offsets = [0, 8], sizes = [16, 8], strides = [1, 1]} : vector<16x32xf32> to vector<16x8xf32>
    %62 = vector.shape_cast %61 : vector<16x8xf32> to vector<1x16x8xf32>
    %63 = arith.truncf %62 : vector<1x16x8xf32> to vector<1x16x8xbf16>
    "tpu.trace_start"() <{level = 10 : i32, message = "bqd,bkd->bqk"}> : () -> ()
    %cst_35 = arith.constant dense<0.000000e+00> : vector<1x16x16xf32>
    %64 = tpu.matmul %57, %60, %cst_35 {dimension_numbers = #tpu.dot_dimension_numbers<[2], [2], [1], [1], [0, 0, 0, 1, 1, 1], [0], [0]>} : vector<1x16x8xbf16>, vector<1x16x8xbf16>, vector<1x16x16xf32> -> vector<1x16x16xf32>
    "tpu.trace_stop"() : () -> ()
    %65 = vector.shape_cast %6 : vector<1x16xf32> to vector<1x1x16xf32>
    %66 = vector.broadcast %65 : vector<1x1x16xf32> to vector<1x16x16xf32>
    %67 = arith.addf %64, %66 : vector<1x16x16xf32>
    %cst_36 = arith.constant dense<0xFF800000> : vector<1x16xf32>
    %68 = vector.multi_reduction <maximumf>, %67, %cst_36 [2] : vector<1x16x16xf32> to vector<1x16xf32>
    %69 = vector.shape_cast %68 : vector<1x16xf32> to vector<1x16x1xf32>
    %70 = vector.broadcast %69 : vector<1x16x1xf32> to vector<1x16x16xf32>
    %71 = arith.subf %67, %70 : vector<1x16x16xf32>
    %72 = math.exp %71 : vector<1x16x16xf32>
    %cst_37 = arith.constant dense<0.000000e+00> : vector<1x16xf32>
    %73 = vector.multi_reduction <add>, %72, %cst_37 [2] : vector<1x16x16xf32> to vector<1x16xf32>
    %74 = vector.shape_cast %73 : vector<1x16xf32> to vector<1x16x1xf32>
    %75 = tpu.reciprocal %74 {approx = true} : vector<1x16x1xf32> -> vector<1x16x1xf32>
    %76 = vector.broadcast %75 : vector<1x16x1xf32> to vector<1x16x16xf32>
    %77 = arith.mulf %72, %76 : vector<1x16x16xf32>
    %78 = arith.truncf %77 : vector<1x16x16xf32> to vector<1x16x16xbf16>
    "tpu.trace_start"() <{level = 10 : i32, message = "bqk,bkd->bqd"}> : () -> ()
    %cst_38 = arith.constant dense<0.000000e+00> : vector<1x16x8xf32>
    %79 = tpu.matmul %78, %63, %cst_38 {dimension_numbers = #tpu.dot_dimension_numbers<[2], [1], [1], [2], [0, 0, 0, 1, 1, 2], [0], [0]>} : vector<1x16x16xbf16>, vector<1x16x8xbf16>, vector<1x16x8xf32> -> vector<1x16x8xf32>
    "tpu.trace_stop"() : () -> ()
    %80 = vector.shape_cast %79 : vector<1x16x8xf32> to vector<16x8xf32>
    %c0_39 = arith.constant 0 : index
    %c8 = arith.constant 8 : index
    %81 = vector.load %arg24[%c0_39, %c8] : memref<16x32xf32, #tpu.memory_space<vmem>>, vector<16x8xf32>
    tpu.vector_store %arg24[%c0_39, %c8], %80 {strides = array<i32>} : memref<16x32xf32, #tpu.memory_space<vmem>>, vector<16x8xf32>,
    %82 = vector.extract_strided_slice %13 {offsets = [0, 16], sizes = [16, 8], strides = [1, 1]} : vector<16x32xf32> to vector<16x8xf32>
    %83 = vector.shape_cast %82 : vector<16x8xf32> to vector<1x16x8xf32>
    %84 = arith.truncf %83 : vector<1x16x8xf32> to vector<1x16x8xbf16>
    %85 = vector.extract_strided_slice %20 {offsets = [0, 16], sizes = [16, 8], strides = [1, 1]} : vector<16x32xf32> to vector<16x8xf32>
    %86 = vector.shape_cast %85 : vector<16x8xf32> to vector<1x16x8xf32>
    %87 = arith.truncf %86 : vector<1x16x8xf32> to vector<1x16x8xbf16>
    %88 = vector.extract_strided_slice %27 {offsets = [0, 16], sizes = [16, 8], strides = [1, 1]} : vector<16x32xf32> to vector<16x8xf32>
    %89 = vector.shape_cast %88 : vector<16x8xf32> to vector<1x16x8xf32>
    %90 = arith.truncf %89 : vector<1x16x8xf32> to vector<1x16x8xbf16>
    "tpu.trace_start"() <{level = 10 : i32, message = "bqd,bkd->bqk"}> : () -> ()
    %cst_40 = arith.constant dense<0.000000e+00> : vector<1x16x16xf32>
    %91 = tpu.matmul %84, %87, %cst_40 {dimension_numbers = #tpu.dot_dimension_numbers<[2], [2], [1], [1], [0, 0, 0, 1, 1, 1], [0], [0]>} : vector<1x16x8xbf16>, vector<1x16x8xbf16>, vector<1x16x16xf32> -> vector<1x16x16xf32>
    "tpu.trace_stop"() : () -> ()
    %92 = vector.shape_cast %6 : vector<1x16xf32> to vector<1x1x16xf32>
    %93 = vector.broadcast %92 : vector<1x1x16xf32> to vector<1x16x16xf32>
    %94 = arith.addf %91, %93 : vector<1x16x16xf32>
    %cst_41 = arith.constant dense<0xFF800000> : vector<1x16xf32>
    %95 = vector.multi_reduction <maximumf>, %94, %cst_41 [2] : vector<1x16x16xf32> to vector<1x16xf32>
    %96 = vector.shape_cast %95 : vector<1x16xf32> to vector<1x16x1xf32>
    %97 = vector.broadcast %96 : vector<1x16x1xf32> to vector<1x16x16xf32>
    %98 = arith.subf %94, %97 : vector<1x16x16xf32>
    %99 = math.exp %98 : vector<1x16x16xf32>
    %cst_42 = arith.constant dense<0.000000e+00> : vector<1x16xf32>
    %100 = vector.multi_reduction <add>, %99, %cst_42 [2] : vector<1x16x16xf32> to vector<1x16xf32>
    %101 = vector.shape_cast %100 : vector<1x16xf32> to vector<1x16x1xf32>
    %102 = tpu.reciprocal %101 {approx = true} : vector<1x16x1xf32> -> vector<1x16x1xf32>
    %103 = vector.broadcast %102 : vector<1x16x1xf32> to vector<1x16x16xf32>
    %104 = arith.mulf %99, %103 : vector<1x16x16xf32>
    %105 = arith.truncf %104 : vector<1x16x16xf32> to vector<1x16x16xbf16>
    "tpu.trace_start"() <{level = 10 : i32, message = "bqk,bkd->bqd"}> : () -> ()
    %cst_43 = arith.constant dense<0.000000e+00> : vector<1x16x8xf32>
    %106 = tpu.matmul %105, %90, %cst_43 {dimension_numbers = #tpu.dot_dimension_numbers<[2], [1], [1], [2], [0, 0, 0, 1, 1, 2], [0], [0]>} : vector<1x16x16xbf16>, vector<1x16x8xbf16>, vector<1x16x8xf32> -> vector<1x16x8xf32>
    "tpu.trace_stop"() : () -> ()
    %107 = vector.shape_cast %106 : vector<1x16x8xf32> to vector<16x8xf32>
    %c0_44 = arith.constant 0 : index
    %c16 = arith.constant 16 : index
    %108 = vector.load %arg24[%c0_44, %c16] : memref<16x32xf32, #tpu.memory_space<vmem>>, vector<16x8xf32>
    tpu.vector_store %arg24[%c0_44, %c16], %107 {strides = array<i32>} : memref<16x32xf32, #tpu.memory_space<vmem>>, vector<16x8xf32>,
    %109 = vector.extract_strided_slice %13 {offsets = [0, 24], sizes = [16, 8], strides = [1, 1]} : vector<16x32xf32> to vector<16x8xf32>
    %110 = vector.shape_cast %109 : vector<16x8xf32> to vector<1x16x8xf32>
    %111 = arith.truncf %110 : vector<1x16x8xf32> to vector<1x16x8xbf16>
    %112 = vector.extract_strided_slice %20 {offsets = [0, 24], sizes = [16, 8], strides = [1, 1]} : vector<16x32xf32> to vector<16x8xf32>
    %113 = vector.shape_cast %112 : vector<16x8xf32> to vector<1x16x8xf32>
    %114 = arith.truncf %113 : vector<1x16x8xf32> to vector<1x16x8xbf16>
    %115 = vector.extract_strided_slice %27 {offsets = [0, 24], sizes = [16, 8], strides = [1, 1]} : vector<16x32xf32> to vector<16x8xf32>
    %116 = vector.shape_cast %115 : vector<16x8xf32> to vector<1x16x8xf32>
    %117 = arith.truncf %116 : vector<1x16x8xf32> to vector<1x16x8xbf16>
    "tpu.trace_start"() <{level = 10 : i32, message = "bqd,bkd->bqk"}> : () -> ()
    %cst_45 = arith.constant dense<0.000000e+00> : vector<1x16x16xf32>
    %118 = tpu.matmul %111, %114, %cst_45 {dimension_numbers = #tpu.dot_dimension_numbers<[2], [2], [1], [1], [0, 0, 0, 1, 1, 1], [0], [0]>} : vector<1x16x8xbf16>, vector<1x16x8xbf16>, vector<1x16x16xf32> -> vector<1x16x16xf32>
    "tpu.trace_stop"() : () -> ()
    %119 = vector.shape_cast %6 : vector<1x16xf32> to vector<1x1x16xf32>
    %120 = vector.broadcast %119 : vector<1x1x16xf32> to vector<1x16x16xf32>
    %121 = arith.addf %118, %120 : vector<1x16x16xf32>
    %cst_46 = arith.constant dense<0xFF800000> : vector<1x16xf32>
    %122 = vector.multi_reduction <maximumf>, %121, %cst_46 [2] : vector<1x16x16xf32> to vector<1x16xf32>
    %123 = vector.shape_cast %122 : vector<1x16xf32> to vector<1x16x1xf32>
    %124 = vector.broadcast %123 : vector<1x16x1xf32> to vector<1x16x16xf32>
    %125 = arith.subf %121, %124 : vector<1x16x16xf32>
    %126 = math.exp %125 : vector<1x16x16xf32>
    %cst_47 = arith.constant dense<0.000000e+00> : vector<1x16xf32>
    %127 = vector.multi_reduction <add>, %126, %cst_47 [2] : vector<1x16x16xf32> to vector<1x16xf32>
    %128 = vector.shape_cast %127 : vector<1x16xf32> to vector<1x16x1xf32>
    %129 = tpu.reciprocal %128 {approx = true} : vector<1x16x1xf32> -> vector<1x16x1xf32>
    %130 = vector.broadcast %129 : vector<1x16x1xf32> to vector<1x16x16xf32>
    %131 = arith.mulf %126, %130 : vector<1x16x16xf32>
    %132 = arith.truncf %131 : vector<1x16x16xf32> to vector<1x16x16xbf16>
    "tpu.trace_start"() <{level = 10 : i32, message = "bqk,bkd->bqd"}> : () -> ()
    %cst_48 = arith.constant dense<0.000000e+00> : vector<1x16x8xf32>
    %133 = tpu.matmul %132, %117, %cst_48 {dimension_numbers = #tpu.dot_dimension_numbers<[2], [1], [1], [2], [0, 0, 0, 1, 1, 2], [0], [0]>} : vector<1x16x16xbf16>, vector<1x16x8xbf16>, vector<1x16x8xf32> -> vector<1x16x8xf32>
    "tpu.trace_stop"() : () -> ()
    %134 = vector.shape_cast %133 : vector<1x16x8xf32> to vector<16x8xf32>
    %c0_49 = arith.constant 0 : index
    %c24 = arith.constant 24 : index
    %135 = vector.load %arg24[%c0_49, %c24] : memref<16x32xf32, #tpu.memory_space<vmem>>, vector<16x8xf32>
    tpu.vector_store %arg24[%c0_49, %c24], %134 {strides = array<i32>} : memref<16x32xf32, #tpu.memory_space<vmem>>, vector<16x8xf32>,
    %c0_50 = arith.constant 0 : index
    %c0_51 = arith.constant 0 : index
    %136 = vector.load %arg24[%c0_50, %c0_51] : memref<16x32xf32, #tpu.memory_space<vmem>>, vector<16x32xf32>
    %137 = arith.truncf %136 : vector<16x32xf32> to vector<16x32xbf16>
    %c0_52 = arith.constant 0 : index
    %c0_53 = arith.constant 0 : index
    %c0_54 = arith.constant 0 : index
    %138 = vector.load %arg10[%c0_52, %c0_53, %c0_54] : memref<1x32x32xbf16, #tpu.memory_space<vmem>>, vector<1x32x32xbf16>
    %139 = vector.shape_cast %138 : vector<1x32x32xbf16> to vector<32x32xbf16>
    %cst_55 = arith.constant dense<0.000000e+00> : vector<16x32xf32>
    %140 = tpu.matmul %137, %139, %cst_55 {dimension_numbers = #tpu.dot_dimension_numbers<[1], [0], [0], [1], [0, 0, 1, 1], [], []>} : vector<16x32xbf16>, vector<32x32xbf16>, vector<16x32xf32> -> vector<16x32xf32>
    %c0_56 = arith.constant 0 : index
    %c0_57 = arith.constant 0 : index
    %c0_58 = arith.constant 0 : index
    %141 = vector.load %arg11[%c0_56, %c0_57, %c0_58] : memref<1x1x32xf32, #tpu.memory_space<vmem>>, vector<1x1x32xf32>
    %142 = vector.shape_cast %141 : vector<1x1x32xf32> to vector<1x32xf32>
    %143 = vector.broadcast %142 : vector<1x32xf32> to vector<16x32xf32>
    %144 = arith.addf %140, %143 : vector<16x32xf32>
    %145 = arith.addf %3, %144 : vector<16x32xf32>
    %c0_59 = arith.constant 0 : index
    %c0_60 = arith.constant 0 : index
    %c0_61 = arith.constant 0 : index
    %146 = vector.load %arg16[%c0_59, %c0_60, %c0_61] : memref<1x1x32xf32, #tpu.memory_space<vmem>>, vector<1x1x32xf32>
    %147 = vector.shape_cast %146 : vector<1x1x32xf32> to vector<1x32xf32>
    %148 = vector.broadcast %147 : vector<1x32xf32> to vector<16x32xf32>
    %149 = arith.mulf %145, %148 : vector<16x32xf32>
    %c0_62 = arith.constant 0 : index
    %c0_63 = arith.constant 0 : index
    %c0_64 = arith.constant 0 : index
    %150 = vector.load %arg17[%c0_62, %c0_63, %c0_64] : memref<1x1x32xf32, #tpu.memory_space<vmem>>, vector<1x1x32xf32>
    %151 = vector.shape_cast %150 : vector<1x1x32xf32> to vector<1x32xf32>
    %152 = vector.broadcast %151 : vector<1x32xf32> to vector<16x32xf32>
    %153 = arith.addf %149, %152 : vector<16x32xf32>
    %154 = arith.truncf %153 : vector<16x32xf32> to vector<16x32xbf16>
    %c0_65 = arith.constant 0 : index
    %c0_66 = arith.constant 0 : index
    %c0_67 = arith.constant 0 : index
    %155 = vector.load %arg12[%c0_65, %c0_66, %c0_67] : memref<1x32x64xbf16, #tpu.memory_space<vmem>>, vector<1x32x64xbf16>
    %156 = vector.shape_cast %155 : vector<1x32x64xbf16> to vector<32x64xbf16>
    %cst_68 = arith.constant dense<0.000000e+00> : vector<16x64xf32>
    %157 = tpu.matmul %154, %156, %cst_68 {dimension_numbers = #tpu.dot_dimension_numbers<[1], [0], [0], [1], [0, 0, 1, 1], [], []>} : vector<16x32xbf16>, vector<32x64xbf16>, vector<16x64xf32> -> vector<16x64xf32>
    %c0_69 = arith.constant 0 : index
    %c0_70 = arith.constant 0 : index
    %c0_71 = arith.constant 0 : index
    %158 = vector.load %arg13[%c0_69, %c0_70, %c0_71] : memref<1x1x64xf32, #tpu.memory_space<vmem>>, vector<1x1x64xf32>
    %159 = vector.shape_cast %158 : vector<1x1x64xf32> to vector<1x64xf32>
    %160 = vector.broadcast %159 : vector<1x64xf32> to vector<16x64xf32>
    %161 = arith.addf %157, %160 : vector<16x64xf32>
    %cst_72 = arith.constant 5.000000e-01 : f32
    %162 = vector.broadcast %cst_72 : f32 to vector<16x64xf32>
    %163 = arith.mulf %162, %161 : vector<16x64xf32>
    %cst_73 = arith.constant 0.707106769 : f32
    %164 = vector.broadcast %cst_73 : f32 to vector<16x64xf32>
    %165 = arith.mulf %161, %164 : vector<16x64xf32>
    %cst_74 = arith.constant 0.000000e+00 : f32
    %166 = vector.broadcast %cst_74 : f32 to vector<16x64xf32>
    %167 = arith.cmpf oge, %165, %166 : vector<16x64xf32>
    %cst_75 = arith.constant 1.000000e+00 : f32
    %cst_76 = arith.constant -1.000000e+00 : f32
    %168 = vector.broadcast %cst_75 : f32 to vector<16x64xf32>
    %169 = vector.broadcast %cst_76 : f32 to vector<16x64xf32>
    %170 = arith.select %167, %168, %169 : vector<16x64xi1>, vector<16x64xf32>
    %171 = math.absf %165 : vector<16x64xf32>
    %cst_77 = arith.constant 0.327591091 : f32
    %172 = vector.broadcast %cst_77 : f32 to vector<16x64xf32>
    %173 = arith.mulf %172, %171 : vector<16x64xf32>
    %cst_78 = arith.constant 1.000000e+00 : f32
    %174 = vector.broadcast %cst_78 : f32 to vector<16x64xf32>
    %175 = arith.addf %174, %173 : vector<16x64xf32>
    %176 = tpu.reciprocal %175 {approx = true} : vector<16x64xf32> -> vector<16x64xf32>
    %cst_79 = arith.constant 1.06140542 : f32
    %177 = vector.broadcast %cst_79 : f32 to vector<16x64xf32>
    %178 = arith.mulf %177, %176 : vector<16x64xf32>
    %cst_80 = arith.constant -1.45315206 : f32
    %179 = vector.broadcast %cst_80 : f32 to vector<16x64xf32>
    %180 = arith.addf %178, %179 : vector<16x64xf32>
    %181 = arith.mulf %180, %176 : vector<16x64xf32>
    %cst_81 = arith.constant 1.42141378 : f32
    %182 = vector.broadcast %cst_81 : f32 to vector<16x64xf32>
    %183 = arith.addf %181, %182 : vector<16x64xf32>
    %184 = arith.mulf %183, %176 : vector<16x64xf32>
    %cst_82 = arith.constant -0.284496725 : f32
    %185 = vector.broadcast %cst_82 : f32 to vector<16x64xf32>
    %186 = arith.addf %184, %185 : vector<16x64xf32>
    %187 = arith.mulf %186, %176 : vector<16x64xf32>
    %cst_83 = arith.constant 0.254829586 : f32
    %188 = vector.broadcast %cst_83 : f32 to vector<16x64xf32>
    %189 = arith.addf %187, %188 : vector<16x64xf32>
    %190 = arith.mulf %189, %176 : vector<16x64xf32>
    %cst_84 = arith.constant 0.000000e+00 : f32
    %191 = vector.broadcast %cst_84 : f32 to vector<16x64xf32>
    %192 = arith.subf %191, %171 : vector<16x64xf32>
    %193 = arith.mulf %192, %171 : vector<16x64xf32>
    %194 = math.exp %193 : vector<16x64xf32>
    %195 = arith.mulf %190, %194 : vector<16x64xf32>
    %cst_85 = arith.constant 1.000000e+00 : f32
    %196 = vector.broadcast %cst_85 : f32 to vector<16x64xf32>
    %197 = arith.subf %196, %195 : vector<16x64xf32>
    %198 = arith.mulf %170, %197 : vector<16x64xf32>
    %cst_86 = arith.constant 1.000000e+00 : f32
    %199 = vector.broadcast %cst_86 : f32 to vector<16x64xf32>
    %200 = arith.addf %199, %198 : vector<16x64xf32>
    %201 = arith.mulf %163, %200 : vector<16x64xf32>
    %202 = arith.truncf %201 : vector<16x64xf32> to vector<16x64xbf16>
    %c0_87 = arith.constant 0 : index
    %c0_88 = arith.constant 0 : index
    %c0_89 = arith.constant 0 : index
    %203 = vector.load %arg14[%c0_87, %c0_88, %c0_89] : memref<1x64x32xbf16, #tpu.memory_space<vmem>>, vector<1x64x32xbf16>
    %204 = vector.shape_cast %203 : vector<1x64x32xbf16> to vector<64x32xbf16>
    %cst_90 = arith.constant dense<0.000000e+00> : vector<16x32xf32>
    %205 = tpu.matmul %202, %204, %cst_90 {dimension_numbers = #tpu.dot_dimension_numbers<[1], [0], [0], [1], [0, 0, 1, 1], [], []>} : vector<16x64xbf16>, vector<64x32xbf16>, vector<16x32xf32> -> vector<16x32xf32>
    %c0_91 = arith.constant 0 : index
    %c0_92 = arith.constant 0 : index
    %c0_93 = arith.constant 0 : index
    %206 = vector.load %arg15[%c0_91, %c0_92, %c0_93] : memref<1x1x32xf32, #tpu.memory_space<vmem>>, vector<1x1x32xf32>
    %207 = vector.shape_cast %206 : vector<1x1x32xf32> to vector<1x32xf32>
    %208 = vector.broadcast %207 : vector<1x32xf32> to vector<16x32xf32>
    %209 = arith.addf %205, %208 : vector<16x32xf32>
    %210 = arith.addf %153, %209 : vector<16x32xf32>
    %c0_94 = arith.constant 0 : index
    %c0_95 = arith.constant 0 : index
    %c0_96 = arith.constant 0 : index
    %211 = vector.load %arg18[%c0_94, %c0_95, %c0_96] : memref<1x1x32xf32, #tpu.memory_space<vmem>>, vector<1x1x32xf32>
    %212 = vector.shape_cast %211 : vector<1x1x32xf32> to vector<1x32xf32>
    %213 = vector.broadcast %212 : vector<1x32xf32> to vector<16x32xf32>
    %214 = arith.mulf %210, %213 : vector<16x32xf32>
    %c0_97 = arith.constant 0 : index
    %c0_98 = arith.constant 0 : index
    %c0_99 = arith.constant 0 : index
    %215 = vector.load %arg19[%c0_97, %c0_98, %c0_99] : memref<1x1x32xf32, #tpu.memory_space<vmem>>, vector<1x1x32xf32>
    %216 = vector.shape_cast %215 : vector<1x1x32xf32> to vector<1x32xf32>
    %217 = vector.broadcast %216 : vector<1x32xf32> to vector<16x32xf32>
    %218 = arith.addf %214, %217 : vector<16x32xf32>
    %c0_100 = arith.constant 0 : index
    %c0_101 = arith.constant 0 : index
    %219 = vector.load %arg23[%c0_100, %c0_101] : memref<16x32xf32, #tpu.memory_space<vmem>>, vector<16x32xf32>
    tpu.vector_store %arg23[%c0_100, %c0_101], %218 {strides = array<i32>} : memref<16x32xf32, #tpu.memory_space<vmem>>, vector<16x32xf32>,
    %c1_i32 = arith.constant 1 : i32
    %220 = arith.cmpi eq, %arg1, %c1_i32 : i32
    %221 = arith.extui %220 : i1 to i32
    %c0_i32_102 = arith.constant 0 : i32
    %222 = arith.cmpi ne, %221, %c0_i32_102 : i32
    scf.if %222 {
      %cst_103 = arith.constant 5.000000e-01 : f32
      %223 = vector.broadcast %cst_103 : f32 to vector<16x32xf32>
      %224 = arith.mulf %223, %218 : vector<16x32xf32>
      %cst_104 = arith.constant 0.707106769 : f32
      %225 = vector.broadcast %cst_104 : f32 to vector<16x32xf32>
      %226 = arith.mulf %218, %225 : vector<16x32xf32>
      %cst_105 = arith.constant 0.000000e+00 : f32
      %227 = vector.broadcast %cst_105 : f32 to vector<16x32xf32>
      %228 = arith.cmpf oge, %226, %227 : vector<16x32xf32>
      %cst_106 = arith.constant 1.000000e+00 : f32
      %cst_107 = arith.constant -1.000000e+00 : f32
      %229 = vector.broadcast %cst_106 : f32 to vector<16x32xf32>
      %230 = vector.broadcast %cst_107 : f32 to vector<16x32xf32>
      %231 = arith.select %228, %229, %230 : vector<16x32xi1>, vector<16x32xf32>
      %232 = math.absf %226 : vector<16x32xf32>
      %cst_108 = arith.constant 0.327591091 : f32
      %233 = vector.broadcast %cst_108 : f32 to vector<16x32xf32>
      %234 = arith.mulf %233, %232 : vector<16x32xf32>
      %cst_109 = arith.constant 1.000000e+00 : f32
      %235 = vector.broadcast %cst_109 : f32 to vector<16x32xf32>
      %236 = arith.addf %235, %234 : vector<16x32xf32>
      %237 = tpu.reciprocal %236 {approx = true} : vector<16x32xf32> -> vector<16x32xf32>
      %cst_110 = arith.constant 1.06140542 : f32
      %238 = vector.broadcast %cst_110 : f32 to vector<16x32xf32>
      %239 = arith.mulf %238, %237 : vector<16x32xf32>
      %cst_111 = arith.constant -1.45315206 : f32
      %240 = vector.broadcast %cst_111 : f32 to vector<16x32xf32>
      %241 = arith.addf %239, %240 : vector<16x32xf32>
      %242 = arith.mulf %241, %237 : vector<16x32xf32>
      %cst_112 = arith.constant 1.42141378 : f32
      %243 = vector.broadcast %cst_112 : f32 to vector<16x32xf32>
      %244 = arith.addf %242, %243 : vector<16x32xf32>
      %245 = arith.mulf %244, %237 : vector<16x32xf32>
      %cst_113 = arith.constant -0.284496725 : f32
      %246 = vector.broadcast %cst_113 : f32 to vector<16x32xf32>
      %247 = arith.addf %245, %246 : vector<16x32xf32>
      %248 = arith.mulf %247, %237 : vector<16x32xf32>
      %cst_114 = arith.constant 0.254829586 : f32
      %249 = vector.broadcast %cst_114 : f32 to vector<16x32xf32>
      %250 = arith.addf %248, %249 : vector<16x32xf32>
      %251 = arith.mulf %250, %237 : vector<16x32xf32>
      %cst_115 = arith.constant 0.000000e+00 : f32
      %252 = vector.broadcast %cst_115 : f32 to vector<16x32xf32>
      %253 = arith.subf %252, %232 : vector<16x32xf32>
      %254 = arith.mulf %253, %232 : vector<16x32xf32>
      %255 = math.exp %254 : vector<16x32xf32>
      %256 = arith.mulf %251, %255 : vector<16x32xf32>
      %cst_116 = arith.constant 1.000000e+00 : f32
      %257 = vector.broadcast %cst_116 : f32 to vector<16x32xf32>
      %258 = arith.subf %257, %256 : vector<16x32xf32>
      %259 = arith.mulf %231, %258 : vector<16x32xf32>
      %cst_117 = arith.constant 1.000000e+00 : f32
      %260 = vector.broadcast %cst_117 : f32 to vector<16x32xf32>
      %261 = arith.addf %260, %259 : vector<16x32xf32>
      %262 = arith.mulf %224, %261 : vector<16x32xf32>
      %c0_118 = arith.constant 0 : index
      %c0_119 = arith.constant 0 : index
      %c0_120 = arith.constant 0 : index
      %263 = vector.load %arg4[%c0_118, %c0_119, %c0_120] : memref<1x16x1xf32, #tpu.memory_space<vmem>>, vector<1x16x1xf32>
      %264 = vector.shape_cast %263 : vector<1x16x1xf32> to vector<16x1xf32>
      %265 = vector.broadcast %264 : vector<16x1xf32> to vector<16x32xf32>
      %266 = arith.mulf %262, %265 : vector<16x32xf32>
      %c0_121 = arith.constant 0 : index
      %c0_122 = arith.constant 0 : index
      %267 = vector.load %arg20[%c0_121, %c0_122] : memref<1x32xf32, #tpu.memory_space<vmem>>, vector<1x32xf32>
      %268 = vector.broadcast %267 : vector<1x32xf32> to vector<16x32xf32>
      %269 = arith.mulf %266, %268 : vector<16x32xf32>
      %cst_123 = arith.constant dense<0.000000e+00> : vector<16xf32>
      %270 = vector.multi_reduction <add>, %269, %cst_123 [1] : vector<16x32xf32> to vector<16xf32>
      %271 = vector.shape_cast %270 : vector<16xf32> to vector<16x1xf32>
      %c0_124 = arith.constant 0 : index
      %c0_125 = arith.constant 0 : index
      %272 = vector.load %arg21[%c0_124, %c0_125] : memref<1x1xf32, #tpu.memory_space<vmem>>, vector<1x1xf32>
      %273 = vector.broadcast %272 : vector<1x1xf32> to vector<16x1xf32>
      %274 = arith.addf %271, %273 : vector<16x1xf32>
      %c0_126 = arith.constant 0 : index
      %c0_127 = arith.constant 0 : index
      %c0_128 = arith.constant 0 : index
      %275 = vector.load %arg22[%c0_126, %c0_127, %c0_128] : memref<1x16x1xf32, #tpu.memory_space<vmem>>, vector<1x16x1xf32>
      %276 = vector.shape_cast %275 : vector<1x16x1xf32> to vector<16x1xf32>
      %277 = vector.shape_cast %274 : vector<16x1xf32> to vector<1x16x1xf32>
      tpu.vector_store %arg22[%c0_126, %c0_127, %c0_128], %277 {strides = array<i32>} : memref<1x16x1xf32, #tpu.memory_space<vmem>>, vector<1x16x1xf32>,
    } else {
    }
    return
  }
  func.func @transform_0(%arg0: i32, %arg1: i32) -> (i32, i32, i32) {
    %c0_i32 = arith.constant 0 : i32
    %c0_i32_0 = arith.constant 0 : i32
    %c0_i32_1 = arith.constant 0 : i32
    return %arg0, %c0_i32, %c0_i32_0 : i32, i32, i32
  }
  func.func @transform_1(%arg0: i32, %arg1: i32) -> (i32, i32, i32) {
    %c0_i32 = arith.constant 0 : i32
    %c0_i32_0 = arith.constant 0 : i32
    %c0_i32_1 = arith.constant 0 : i32
    return %arg0, %c0_i32, %c0_i32_0 : i32, i32, i32
  }
  func.func @transform_2(%arg0: i32, %arg1: i32) -> (i32, i32, i32) {
    %c0_i32 = arith.constant 0 : i32
    %c0_i32_0 = arith.constant 0 : i32
    %c0_i32_1 = arith.constant 0 : i32
    return %arg0, %c0_i32, %c0_i32_0 : i32, i32, i32
  }
  func.func @transform_3(%arg0: i32, %arg1: i32) -> (i32, i32) {
    %c0_i32 = arith.constant 0 : i32
    %c0_i32_0 = arith.constant 0 : i32
    %c0_i32_1 = arith.constant 0 : i32
    return %c0_i32, %c0_i32_0 : i32, i32
  }
  func.func @transform_4(%arg0: i32, %arg1: i32) -> (i32, i32) {
    %c0_i32 = arith.constant 0 : i32
    %c0_i32_0 = arith.constant 0 : i32
    %c0_i32_1 = arith.constant 0 : i32
    return %c0_i32, %c0_i32_0 : i32, i32
  }
  func.func @transform_5(%arg0: i32, %arg1: i32) -> (i32, i32) {
    %c0_i32 = arith.constant 0 : i32
    %c0_i32_0 = arith.constant 0 : i32
    %c0_i32_1 = arith.constant 0 : i32
    return %c0_i32, %c0_i32_0 : i32, i32
  }
  func.func @transform_6(%arg0: i32, %arg1: i32) -> (i32, i32, i32, i32) {
    %c0_i32 = arith.constant 0 : i32
    %c0_i32_0 = arith.constant 0 : i32
    %c0_i32_1 = arith.constant 0 : i32
    %c0_i32_2 = arith.constant 0 : i32
    return %arg1, %c0_i32, %c0_i32_0, %c0_i32_1 : i32, i32, i32, i32
  }
  func.func @transform_7(%arg0: i32, %arg1: i32) -> (i32, i32, i32, i32) {
    %c0_i32 = arith.constant 0 : i32
    %c0_i32_0 = arith.constant 0 : i32
    %c0_i32_1 = arith.constant 0 : i32
    %c0_i32_2 = arith.constant 0 : i32
    return %arg1, %c0_i32, %c0_i32_0, %c0_i32_1 : i32, i32, i32, i32
  }
  func.func @transform_8(%arg0: i32, %arg1: i32) -> (i32, i32, i32) {
    %c0_i32 = arith.constant 0 : i32
    %c0_i32_0 = arith.constant 0 : i32
    %c0_i32_1 = arith.constant 0 : i32
    return %arg1, %c0_i32, %c0_i32_0 : i32, i32, i32
  }
  func.func @transform_9(%arg0: i32, %arg1: i32) -> (i32, i32, i32) {
    %c0_i32 = arith.constant 0 : i32
    %c0_i32_0 = arith.constant 0 : i32
    %c0_i32_1 = arith.constant 0 : i32
    return %arg1, %c0_i32, %c0_i32_0 : i32, i32, i32
  }
  func.func @transform_10(%arg0: i32, %arg1: i32) -> (i32, i32, i32) {
    %c0_i32 = arith.constant 0 : i32
    %c0_i32_0 = arith.constant 0 : i32
    %c0_i32_1 = arith.constant 0 : i32
    return %arg1, %c0_i32, %c0_i32_0 : i32, i32, i32
  }
  func.func @transform_11(%arg0: i32, %arg1: i32) -> (i32, i32, i32) {
    %c0_i32 = arith.constant 0 : i32
    %c0_i32_0 = arith.constant 0 : i32
    %c0_i32_1 = arith.constant 0 : i32
    return %arg1, %c0_i32, %c0_i32_0 : i32, i32, i32
  }
  func.func @transform_12(%arg0: i32, %arg1: i32) -> (i32, i32, i32) {
    %c0_i32 = arith.constant 0 : i32
    %c0_i32_0 = arith.constant 0 : i32
    %c0_i32_1 = arith.constant 0 : i32
    return %arg1, %c0_i32, %c0_i32_0 : i32, i32, i32
  }
  func.func @transform_13(%arg0: i32, %arg1: i32) -> (i32, i32, i32) {
    %c0_i32 = arith.constant 0 : i32
    %c0_i32_0 = arith.constant 0 : i32
    %c0_i32_1 = arith.constant 0 : i32
    return %arg1, %c0_i32, %c0_i32_0 : i32, i32, i32
  }
  func.func @transform_14(%arg0: i32, %arg1: i32) -> (i32, i32, i32) {
    %c0_i32 = arith.constant 0 : i32
    %c0_i32_0 = arith.constant 0 : i32
    %c0_i32_1 = arith.constant 0 : i32
    return %arg1, %c0_i32, %c0_i32_0 : i32, i32, i32
  }
  func.func @transform_15(%arg0: i32, %arg1: i32) -> (i32, i32, i32) {
    %c0_i32 = arith.constant 0 : i32
    %c0_i32_0 = arith.constant 0 : i32
    %c0_i32_1 = arith.constant 0 : i32
    return %arg1, %c0_i32, %c0_i32_0 : i32, i32, i32
  }
  func.func @transform_16(%arg0: i32, %arg1: i32) -> (i32, i32, i32) {
    %c0_i32 = arith.constant 0 : i32
    %c0_i32_0 = arith.constant 0 : i32
    %c0_i32_1 = arith.constant 0 : i32
    return %arg1, %c0_i32, %c0_i32_0 : i32, i32, i32
  }
  func.func @transform_17(%arg0: i32, %arg1: i32) -> (i32, i32, i32) {
    %c0_i32 = arith.constant 0 : i32
    %c0_i32_0 = arith.constant 0 : i32
    %c0_i32_1 = arith.constant 0 : i32
    return %arg1, %c0_i32, %c0_i32_0 : i32, i32, i32
  }
  func.func @transform_18(%arg0: i32, %arg1: i32) -> (i32, i32) {
    %c0_i32 = arith.constant 0 : i32
    %c0_i32_0 = arith.constant 0 : i32
    %c0_i32_1 = arith.constant 0 : i32
    return %c0_i32, %c0_i32_0 : i32, i32
  }
  func.func @transform_19(%arg0: i32, %arg1: i32) -> (i32, i32) {
    %c0_i32 = arith.constant 0 : i32
    %c0_i32_0 = arith.constant 0 : i32
    %c0_i32_1 = arith.constant 0 : i32
    return %c0_i32, %c0_i32_0 : i32, i32
  }
  func.func @transform_20(%arg0: i32, %arg1: i32) -> (i32, i32, i32) {
    %c0_i32 = arith.constant 0 : i32
    %c0_i32_0 = arith.constant 0 : i32
    %c0_i32_1 = arith.constant 0 : i32
    return %arg0, %c0_i32, %c0_i32_0 : i32, i32, i32
  }
}

</mosaic_0001>

<bundles_post_ra>
// kernel: _lambda_.1
= control target key start
LH: loop header
LB: loop body
LE: loop exit
PB: predicated region body
PF: predicated region fallthrough
CT: control target
= control target key end

     0   :  { %s4002_s0 = inlined_call_operand.vmem [shape: bf16[2,16,8], index: 0, kind: input, shape index: {}]   ;;  %s4003_s1 = inlined_call_operand.vmem [shape: f32[2,1,16], index: 1, kind: input, shape index: {}]   ;;  %s4004_s2 = inlined_call_operand.vmem [shape: f32[2,16,1], index: 2, kind: input, shape index: {}]   ;;  %s4005_s3 = inlined_call_operand.vmem [shape: f32[16,32], index: 3, kind: input, shape index: {}]   ;;  %s4006_s4 = inlined_call_operand.hbm [shape: bf16[8,32], index: 4, kind: input, shape index: {}]   ;;  %s4007_s5 = inlined_call_operand.hbm [shape: f32[1,32], index: 5, kind: input, shape index: {}]   ;;  %s4008_s6 = inlined_call_operand.vmem [shape: bf16[2,3,32,32], index: 6, kind: input, shape index: {}]   ;;  %s4009_s7 = inlined_call_operand.hbm [shape: f32[2,3,1,32], index: 7, kind: input, shape index: {}]   ;;  %s4010_s8 = inlined_call_operand.hbm [shape: bf16[2,32,32], index: 8, kind: input, shape index: {}]   ;;  %s4011_s9 = inlined_call_operand.hbm [shape: f32[2,1,32], index: 9, kind: input, shape index: {}]   ;;  %s4012_s10 = inlined_call_operand.vmem [shape: bf16[2,32,64], index: 10, kind: input, shape index: {}]   ;;  %s4013_s11 = inlined_call_operand.hbm [shape: f32[2,1,64], index: 11, kind: input, shape index: {}]   ;;  %s4014_s12 = inlined_call_operand.hbm [shape: bf16[2,64,32], index: 12, kind: input, shape index: {}]   ;;  %s4015_s13 = inlined_call_operand.hbm [shape: f32[2,1,32], index: 13, kind: input, shape index: {}]   ;;  %s4016_s14 = inlined_call_operand.hbm [shape: f32[2,1,32], index: 14, kind: input, shape index: {}]   ;;  %s4017_s15 = inlined_call_operand.hbm [shape: f32[2,1,32], index: 15, kind: input, shape index: {}]   ;;  %s4018_s16 = inlined_call_operand.vmem [shape: f32[2,1,32], index: 16, kind: input, shape index: {}]   ;;  %s4019_s17 = inlined_call_operand.vmem [shape: f32[2,1,32], index: 17, kind: input, shape index: {}]   ;;  %s4020_s18 = inlined_call_operand.vmem [shape: f32[1,32], index: 18, kind: input, shape index: {}]   ;;  %s4021_s19 = inlined_call_operand.<no memory space> [shape: f32[1,1], index: 19, kind: input, shape index: {}]   ;;  %s4022_s20 = inlined_call_operand.vmem [shape: f32[2,16,1], index: 20, kind: output, shape index: {}]  }
   0x1   :  { %4038 = sst [smem:[#allocation32_spill]] %s4002_s0  ;;  %v25_v0 = vstv %s4021_s19 }
   0x2   :  { %4039 = sst [smem:[#allocation33_spill]] %s4003_s1  ;;  %26 = vst [vmem:[#allocation4] sm:$0x1] %v25_v0 }
   0x3   :  { %4040 = sst [smem:[#allocation34_spill]] %s4004_s2 }
   0x4   :  { %4041 = sst [smem:[#allocation35_spill]] %s4005_s3 }
   0x5   :  { %4042 = sst [smem:[#allocation36_spill]] %s4006_s4 }
   0x6   :  { %4043 = sst [smem:[#allocation37_spill]] %s4007_s5 }
   0x7   :  { %4044 = sst [smem:[#allocation38_spill]] %s4008_s6 }
   0x8   :  { %4045 = sst [smem:[#allocation39_spill]] %s4009_s7 }
   0x9   :  { %4046 = sst [smem:[#allocation40_spill]] %s4010_s8 }
   0xa   :  { %4047 = sst [smem:[#allocation41_spill]] %s4011_s9 }
   0xb   :  { %4048 = sst [smem:[#allocation42_spill]] %s4012_s10 }
   0xc   :  { %4049 = sst [smem:[#allocation43_spill]] %s4013_s11 }
   0xd   :  { %4050 = sst [smem:[#allocation44_spill]] %s4014_s12 }
   0xe   :  { %4051 = sst [smem:[#allocation45_spill]] %s4015_s13 }
   0xf   :  { %4052 = sst [smem:[#allocation46_spill]] %s4016_s14 }
  0x10   :  { %4053 = sst [smem:[#allocation47_spill]] %s4017_s15 }
  0x11   :  { %4054 = sst [smem:[#allocation48_spill]] %s4018_s16 }
  0x12   :  { %4055 = sst [smem:[#allocation49_spill]] %s4019_s17 }
  0x13   :  { %4056 = sst [smem:[#allocation50_spill]] %s4020_s18 }
  0x14   :  { %4057 = sst [smem:[#allocation51_spill]] %s4022_s20 }
  0x15   :  { %27 = vsyncpa [#allocation6], 0 }
  0x16   :  { %28 = vsyncpa [#allocation8], 0  ;;  %s3494_s23 = smov 0   ;;  %s3496_s24 = smov 0  }
  0x17   :  { %s3498_s2 = smov 0   ;;  %s3500_s25 = smov 0  }
  0x18   :  { %s3502_s3 = smov 0   ;;  %s3504_s26 = smov 0  }
  0x19   :  { %s3506_s27 = smov 0   ;;  %s3508_s28 = smov 0  }
  0x1a LB: > { %4058 = sst [smem:[#allocation20_spill]] %s3333_s24  ;;  %s4024_s19 = sadd.s32 4294967295, %s3357_s28   ;;  %s3357_s28 = sphi %s3508_s28, %s34_s28   ;;  %s3353_s27 = sphi %s3506_s27, %s4118_s27   ;;  %s3349_s26 = sphi %s3504_s26, %s4117_s26   ;;  %s3345_s3 = sphi %s3502_s3, %s4116_s3   ;;  %s3341_s25 = sphi %s3500_s25, %s4115_s25   ;;  %s3337_s2 = sphi %s3498_s2, %s4114_s2   ;;  %s3333_s24 = sphi %s3496_s24, %s4113_s24   ;;  %s3329_s23 = sphi %s3494_s23, %s4112_s23  }
  0x1b   : > { %4059 = sst [smem:[#allocation21_spill]] %s3337_s2  ;;  %s43_s4 = sadd.s32 1, %s3349_s26 }
  0x1c   : > { %4060 = sst [smem:[#allocation22_spill]] %s3341_s25  ;;  %p44_p0 = scmp.ge.s32.totalorder %s43_s4, 2 }
  0x1d   : > { %4061 = sst [smem:[#allocation23_spill]] %s3345_s3  ;;  %s46_s29 = sadd.s32 1, %s3353_s27 }
  0x1e   : > { %4062 = sst [smem:[#allocation24_spill]] %s3349_s26  ;;  %s220_s30 = sadd.s32 1, %s3337_s2 }
  0x1f   : > { %4063 = sst [smem:[#allocation25_spill]] %s3353_s27  ;;  %p227_p1 = scmp.ne.s32.totalorder %s3337_s2, %s3333_s24 }
  0x20   : > { %4064 = sst [smem:[#allocation26_spill]] %s3357_s28  ;;  %s4120_s4 = smov (%p44_p0, %s43_s4), 0 }
  0x21   : > { %4065 = sst [smem:[#allocation27_spill]] %s4120_s4  ;;  %s4122_s29 = smov (!%p44_p0, %s46_s29), %s3353_s27 }
  0x22   : > { %s217_s0 = ssub.s32 %s3349_s26, %s4120_s4  ;;  %p228_p2 = scmp.eq.s32.totalorder %s3357_s28, 0 }
  0x23   : > { %p48_p3 = scmp.ge.s32.totalorder %s4122_s29, 2  ;;  %p218_p4 = scmp.eq.s32.totalorder %s217_s0, 0 }
  0x24   : > { %p3544_p5 = por %p228_p2, %p227_p1  ;;  %p233_p6 = scmp.ne.s32.totalorder %s3333_s24, %s3329_s23 }
  0x25   : > { %s4124_s29 = smov (%p48_p3, %s4122_s29), 0  ;;  %p3556_p7 = scmp.eq.s32.totalorder %s4024_s19, 0 }
  0x26   : > { %4067 = sst [smem:[#allocation28_spill]] %s4124_s29  ;;  %p2557_p8 = scmp.ge.s32.totalorder %s3357_s28, 1 }
  0x27   : > { %s3552_s1 = scalar_select %p218_p4, %s3337_s2, %s220_s30  }
  0x28   : > { %p572_p9 = scmp.lt.s32.totalorder %s3357_s28, 5  ;;  %p3564_p10 = por %p3556_p7, %p233_p6 }
  0x29   : > { %4068 = sst [smem:[#allocation29_spill]] %s3552_s1  ;;  %s3359_s30 = smov [#allocation5]  }
  0x2a   : > { %s4070_s0 = scalar_select %p3564_p10, 1, 0 }
  0x2b   : > { %p3568_p11 = pnand %p2557_p8, %p572_p9  ;;  %s588_s29 = sshll.u32 %s3359_s30, 4  ;;  %s589_s29 = int_to_ptr.vmem [resolvable:$true] %s588_s29 }
  0x2c   : > { %4071 = sst [smem:[#allocation30_spill]] %s4070_s0  ;;  %p2857_p13 = scmp.lt.s32.totalorder %s3357_s28, 4 }
  0x2d   : > { %p2823_p12 = pneg %p3568_p11  ;;  %s3576_s19 = sand.u32 1, %s3337_s2  }
  0x2e   : > { %s646_s4 = sand.u32 1, %s3357_s28   ;;  %p3587_p1 = pnand %p2857_p13, %p3544_p5 }
  0x2f   : > { %p3581_p0 = pnand %p2823_p12, %p3556_p7  ;;  %s2795_s30 = smul.u32 3, %s3576_s19 }
  0x30   : > { %s3018_s18 = scalar_lea.vmem %s589_s29, 64  ;;  %p3026_p8 = scmp.lt.s32.totalorder %s589_s29, %s589_s29 }
  0x31   : > { %p3009_p2 = pneg %p3581_p0  ;;  %p3019_p3 = scmp.ne.s32.totalorder %s589_s29, %s3018_s18 }
  0x32   : > { %p3027_p9 = scmp.lt.s32.totalorder %s3018_s18, %s3018_s18 }
  0x33   : > { %p3021_p4 = pnand %p3019_p3, %p3009_p2 }
  0x34   : > { %p3028_p12 = por %p3027_p9, %p3026_p8 }
  0x35   : > { %p3022_p6 = pneg %p3021_p4 }
  0x37   : > { %p3029_p10 = pnand %p3028_p12, %p3022_p6 }
  0x39   : > { %3032 = shalt.err (!%p3029_p10)
}
  0x3a   : > { %s4075_s20 = sld [smem:[#allocation36_spill]]  ;;  %s2796_s17 = smul.u32 48, %s3349_s26 }
  0x3b   : > { %s650_s10 = scalar_lea.vmem [#allocation9], %s2795_s30  ;;  %s4076_s7 = sld [smem:[#allocation39_spill]] }
  0x3c   : > { %s657_s6 = sshll.u32 %s650_s10, 4  ;;  %s2562_s18 = sshll.u32 %s3576_s19, 4  ;;  %s658_s6 = int_to_ptr.vmem [resolvable:$true] %s657_s6 }
  0x3d   : > { %s3607_s0 = scalar_lea.sflag [#allocation6], %s646_s4  ;;  %p3611_p5 = pneg %p3587_p1 }
  0x3e   : > { %s3046_s2 = scalar_lea.vmem %s658_s6, 48  ;;  %s3360_s10 = smov [#allocation9]  }
  0x3f   : > { %p3047_p10 = scmp.ne.s32.totalorder %s658_s6, %s3046_s2 }
  0x40   : > { %2826 = dma.hbm_to_vmem [thread:$0]  (!%p3581_p0), %s4075_s20, 64, %s589_s29, [#allocation6]  }
  0x41   : > { %s656_s3 = scalar_lea.hbm %s4076_s7, %s2796_s17  ;;  %p3049_p13 = pnand %p3047_p10, %p3611_p5 }
  0x42   : > { %s3051_s20 = sshll.u32 %s3360_s10, 4  ;;  %s3052_s20 = int_to_ptr.vmem [resolvable:$false] %s3051_s20 }
  0x43   : > { %p3050_p3 = pneg %p3049_p13  ;;  %s3053_s16 = scalar_lea.vmem %s3052_s20, 96 }
  0x44   : > { %p3054_p4 = scmp.lt.s32.totalorder %s658_s6, %s3052_s20  ;;  %p3055_p6 = scmp.lt.s32.totalorder %s3053_s16, %s3046_s2 }
  0x46   : > { %p3056_p8 = por %p3055_p6, %p3054_p4 }
  0x48   : > { %p3057_p9 = pnand %p3056_p8, %p3050_p3 }
  0x4a   : > { %3060 = shalt.err (!%p3057_p9)
}
  0x4b   : > { %s3361_s17 = smov 16   ;;  %s3362_s25 = smov 1  }
  0x4c   : > { %2833 = dma.hbm_to_vmem [thread:$0]  (!%p3587_p1), %s656_s3, 48, %s658_s6, %s3607_s0, %s3361_s17, %s3361_s17, %s3362_s25  }
  0x4d   : > { %s2645_s4 = sshll.u32 %s3349_s26, 8  ;;  %s4078_s8 = sld [smem:[#allocation40_spill]] }
  0x4e   : > { %s671_s10 = scalar_lea.vmem [#allocation10], %s2562_s18  ;;  %s3363_s20 = smov [#allocation10]  }
  0x4f   : > { %s678_s7 = sshll.u32 %s671_s10, 4  ;;  %s3079_s16 = sshll.u32 %s3363_s20, 4  ;;  %s679_s7 = int_to_ptr.vmem [resolvable:$true] %s678_s7  ;;  %s3080_s16 = int_to_ptr.vmem [resolvable:$false] %s3079_s16 }
  0x50   : > { %s3074_s2 = scalar_lea.vmem %s679_s7, 256  ;;  %s3081_s28 = scalar_lea.vmem %s3080_s16, 512 }
  0x51   : > { %p3075_p12 = scmp.ne.s32.totalorder %s679_s7, %s3074_s2  ;;  %p3082_p3 = scmp.lt.s32.totalorder %s679_s7, %s3080_s16 }
  0x52   : > { %p3083_p4 = scmp.lt.s32.totalorder %s3081_s28, %s3074_s2 }
  0x53   : > { %s677_s21 = scalar_lea.hbm %s4078_s8, %s2645_s4  ;;  %p3077_p10 = pnand %p3075_p12, %p3611_p5 }
  0x54   : > { %p3084_p6 = por %p3083_p4, %p3082_p3 }
  0x55   : > { %p3078_p13 = pneg %p3077_p10 }
  0x57   : > { %p3085_p8 = pnand %p3084_p6, %p3078_p13 }
  0x59   : > { %3088 = shalt.err (!%p3085_p8)
}
  0x5a   : > { %s4035_s6 = smov 64   ;;  %s3365_s3 = smov 4  }
  0x5b   : > { %2836 = dma.hbm_to_vmem [thread:$0]  (!%p3587_p1), %s677_s21, 256, %s679_s7, %s3607_s0, %s4035_s6, %s4035_s6, %s3365_s3  }
  0x5c   : > { %s3633_s18 = sshll.u32 %s3349_s26, 4  ;;  %s691_s17 = scalar_lea.vmem [#allocation11], %s3576_s19 }
  0x5d   : > { %s698_s28 = sshll.u32 %s691_s17, 4  ;;  %s4079_s9 = sld [smem:[#allocation41_spill]]  ;;  %s699_s28 = int_to_ptr.vmem [resolvable:$true] %s698_s28 }
  0x5e   : > { %s3102_s30 = scalar_lea.vmem %s699_s28, 16  ;;  %s3366_s10 = smov [#allocation11]  }
  0x5f   : > { %p3103_p9 = scmp.ne.s32.totalorder %s699_s28, %s3102_s30  ;;  %s3107_s2 = sshll.u32 %s3366_s10, 4  ;;  %s3108_s2 = int_to_ptr.vmem [resolvable:$false] %s3107_s2 }
  0x60   : > { %s3109_s20 = scalar_lea.vmem %s3108_s2, 32  ;;  %p3110_p13 = scmp.lt.s32.totalorder %s699_s28, %s3108_s2 }
  0x61   : > { %p3105_p12 = pnand %p3103_p9, %p3611_p5  ;;  %p3111_p3 = scmp.lt.s32.totalorder %s3109_s20, %s3102_s30 }
  0x63   : > { %s696_s29 = scalar_lea.hbm %s4079_s9, %s3633_s18  ;;  %p3106_p10 = pneg %p3105_p12 }
  0x64   : > { %p3112_p4 = por %p3111_p3, %p3110_p13 }
  0x66   : > { %p3113_p6 = pnand %p3112_p4, %p3106_p10 }
  0x68   : > { %3116 = shalt.err (!%p3113_p6)
}
  0x69   : > { %2839 = dma.hbm_to_vmem [thread:$0]  (!%p3587_p1), %s696_s29, 16, %s699_s28, %s3607_s0  }
  0x6a   : > { %s4080_s11 = sld [smem:[#allocation43_spill]]  ;;  %s716_s17 = scalar_lea.vmem [#allocation12], %s3576_s19 }
  0x6b   : > { %s723_s25 = sshll.u32 %s716_s17, 4  ;;  %s2567_s4 = sshll.u32 %s3576_s19, 5  ;;  %s724_s25 = int_to_ptr.vmem [resolvable:$true] %s723_s25 }
  0x6c   : > { %s3130_s30 = scalar_lea.vmem %s724_s25, 16  ;;  %s3367_s10 = smov [#allocation12]  }
  0x6d   : > { %p3131_p8 = scmp.ne.s32.totalorder %s724_s25, %s3130_s30  ;;  %s3135_s2 = sshll.u32 %s3367_s10, 4  ;;  %s3136_s2 = int_to_ptr.vmem [resolvable:$false] %s3135_s2 }
  0x6e   : > { %s3137_s20 = scalar_lea.vmem %s3136_s2, 32  ;;  %p3138_p10 = scmp.lt.s32.totalorder %s724_s25, %s3136_s2 }
  0x6f   : > { %p3133_p9 = pnand %p3131_p8, %p3611_p5  ;;  %p3139_p13 = scmp.lt.s32.totalorder %s3137_s20, %s3130_s30 }
  0x70   : > { %s721_s16 = scalar_lea.hbm %s4080_s11, %s3633_s18 }
  0x71   : > { %p3134_p12 = pneg %p3133_p9  ;;  %p3140_p3 = por %p3139_p13, %p3138_p10 }
  0x73   : > { %p3141_p4 = pnand %p3140_p3, %p3134_p12 }
  0x75   : > { %3144 = shalt.err (!%p3141_p4)
}
  0x76   : > { %2842 = dma.hbm_to_vmem [thread:$0]  (!%p3587_p1), %s721_s16, 16, %s724_s25, %s3607_s0  }
  0x77   : > { %s2646_s28 = sshll.u32 %s3349_s26, 9  ;;  %s734_s29 = scalar_lea.vmem [#allocation13], %s2567_s4 }
  0x78   : > { %s741_s7 = sshll.u32 %s734_s29, 4  ;;  %s4081_s12 = sld [smem:[#allocation44_spill]]  ;;  %s742_s7 = int_to_ptr.vmem [resolvable:$true] %s741_s7 }
  0x79   : > { %s3158_s6 = scalar_lea.vmem %s742_s7, 512  ;;  %s3368_s30 = smov [#allocation13]  }
  0x7a   : > { %p3159_p6 = scmp.ne.s32.totalorder %s742_s7, %s3158_s6  ;;  %s3163_s2 = sshll.u32 %s3368_s30, 4  ;;  %s3164_s2 = int_to_ptr.vmem [resolvable:$false] %s3163_s2 }
  0x7b   : > { %s3165_s20 = scalar_lea.vmem %s3164_s2, 1024  ;;  %p3166_p12 = scmp.lt.s32.totalorder %s742_s7, %s3164_s2 }
  0x7c   : > { %p3161_p8 = pnand %p3159_p6, %p3611_p5  ;;  %p3167_p10 = scmp.lt.s32.totalorder %s3165_s20, %s3158_s6 }
  0x7e   : > { %s740_s10 = scalar_lea.hbm %s4081_s12, %s2646_s28  ;;  %p3162_p9 = pneg %p3161_p8 }
  0x7f   : > { %p3168_p13 = por %p3167_p10, %p3166_p12 }
  0x81   : > { %p3169_p3 = pnand %p3168_p13, %p3162_p9 }
  0x83   : > { %3172 = shalt.err (!%p3169_p3)
}
  0x84   : > { %s4082_s16 = smov 64   ;;  %s4083_s13 = sld [smem:[#allocation45_spill]] }
  0x85   : > { %2845 = dma.hbm_to_vmem [thread:$0]  (!%p3587_p1), %s740_s10, 512, %s742_s7, %s3607_s0, %s4082_s16, %s4082_s16, %s3365_s3  }
  0x86   : > { %s754_s29 = scalar_lea.vmem [#allocation14], %s3576_s19  ;;  %s4084_s14 = sld [smem:[#allocation46_spill]] }
  0x87   : > { %s761_s6 = sshll.u32 %s754_s29, 4  ;;  %s3369_s20 = smov [#allocation14]   ;;  %s762_s6 = int_to_ptr.vmem [resolvable:$true] %s761_s6 }
  0x88   : > { %s3186_s2 = scalar_lea.vmem %s762_s6, 16  ;;  %s3191_s8 = sshll.u32 %s3369_s20, 4  ;;  %s3192_s8 = int_to_ptr.vmem [resolvable:$false] %s3191_s8 }
  0x89   : > { %p3187_p4 = scmp.ne.s32.totalorder %s762_s6, %s3186_s2  ;;  %s3193_s3 = scalar_lea.vmem %s3192_s8, 32 }
  0x8a   : > { %s759_s28 = scalar_lea.hbm %s4083_s13, %s3633_s18  ;;  %p3194_p9 = scmp.lt.s32.totalorder %s762_s6, %s3192_s8 }
  0x8b   : > { %p3189_p6 = pnand %p3187_p4, %p3611_p5  ;;  %p3195_p12 = scmp.lt.s32.totalorder %s3193_s3, %s3186_s2 }
  0x8c   : > { %s776_s30 = scalar_lea.hbm %s4084_s14, %s3633_s18 }
  0x8d   : > { %p3190_p8 = pneg %p3189_p6  ;;  %p3196_p10 = por %p3195_p12, %p3194_p9 }
  0x8f   : > { %p3197_p13 = pnand %p3196_p10, %p3190_p8 }
  0x91   : > { %3200 = shalt.err (!%p3197_p13)
}
  0x92   : > { %2848 = dma.hbm_to_vmem [thread:$0]  (!%p3587_p1), %s759_s28, 16, %s762_s6, %s3607_s0  }
  0x93   : > { %s771_s7 = scalar_lea.vmem [#allocation15], %s3576_s19  ;;  %s3370_s16 = smov [#allocation7]  }
  0x94   : > { %s778_s10 = sshll.u32 %s771_s7, 4  ;;  %s599_s25 = sshll.u32 %s3370_s16, 4  ;;  %s779_s10 = int_to_ptr.vmem [resolvable:$true] %s778_s10  ;;  %s600_s25 = int_to_ptr.vmem [resolvable:$true] %s599_s25 }
  0x95   : > { %s3214_s4 = scalar_lea.vmem %s779_s10, 16  ;;  %s3371_s8 = smov [#allocation15]  }
  0x96   : > { %p3215_p3 = scmp.ne.s32.totalorder %s779_s10, %s3214_s4  ;;  %s3219_s29 = sshll.u32 %s3371_s8, 4  ;;  %s3220_s29 = int_to_ptr.vmem [resolvable:$false] %s3219_s29 }
  0x97   : > { %s3221_s21 = scalar_lea.vmem %s3220_s29, 32  ;;  %p3222_p8 = scmp.lt.s32.totalorder %s779_s10, %s3220_s29 }
  0x98   : > { %p3217_p4 = pnand %p3215_p3, %p3611_p5  ;;  %p3223_p9 = scmp.lt.s32.totalorder %s3221_s21, %s3214_s4 }
  0x9a   : > { %p3218_p6 = pneg %p3217_p4  ;;  %p3224_p12 = por %p3223_p9, %p3222_p8 }
  0x9c   : > { %p3225_p10 = pnand %p3224_p12, %p3218_p6 }
  0x9e   : > { %3228 = shalt.err (!%p3225_p10)
}
  0x9f   : > { %2851 = dma.hbm_to_vmem [thread:$0]  (!%p3587_p1), %s776_s30, 16, %s779_s10, %s3607_s0  }
  0xa0   : > { %s3240_s17 = scalar_lea.vmem %s600_s25, 16  ;;  %s3247_s2 = scalar_lea.vmem %s600_s25, 32 }
  0xa1   : > { %p3241_p13 = scmp.ne.s32.totalorder %s600_s25, %s3240_s17  ;;  %p3248_p6 = scmp.lt.s32.totalorder %s600_s25, %s600_s25 }
  0xa2   : > { %p3249_p8 = scmp.lt.s32.totalorder %s3247_s2, %s3240_s17 }
  0xa3   : > { %p3243_p3 = pnand %p3241_p13, %p3009_p2 }
  0xa4   : > { %p3250_p9 = por %p3249_p8, %p3248_p6 }
  0xa5   : > { %p3244_p4 = pneg %p3243_p3 }
  0xa7   : > { %p3251_p12 = pnand %p3250_p9, %p3244_p4 }
  0xa9   : > { %3254 = shalt.err (!%p3251_p12)
}
  0xaa   : > { %s4085_s5 = sld [smem:[#allocation37_spill]]  ;;  %s788_s16 = scalar_lea.vmem [#allocation16], %s3576_s19 }
  0xab   : > { %s4086_s15 = sld [smem:[#allocation47_spill]]  ;;  %s795_s4 = sshll.u32 %s788_s16, 4  ;;  %s796_s4 = int_to_ptr.vmem [resolvable:$true] %s795_s4 }
  0xac   : > { %s3268_s8 = scalar_lea.vmem %s796_s4, 16  ;;  %s3372_s27 = smov [#allocation16]  }
  0xad   : > { %p3269_p2 = scmp.ne.s32.totalorder %s796_s4, %s3268_s8  ;;  %s3273_s29 = sshll.u32 %s3372_s27, 4  ;;  %s3274_s29 = int_to_ptr.vmem [resolvable:$false] %s3273_s29 }
  0xae   : > { %s3275_s21 = scalar_lea.vmem %s3274_s29, 32  ;;  %p3276_p3 = scmp.lt.s32.totalorder %s796_s4, %s3274_s29 }
  0xaf   : > { %p3271_p10 = pnand %p3269_p2, %p3611_p5  ;;  %p3277_p4 = scmp.lt.s32.totalorder %s3275_s21, %s3268_s8 }
  0xb0   : > { %2829 = dma.hbm_to_vmem [thread:$0]  (!%p3581_p0), %s4085_s5, 16, %s600_s25, [#allocation8]  }
  0xb1   : > { %s793_s10 = scalar_lea.hbm %s4086_s15, %s3633_s18  ;;  %p3272_p13 = pneg %p3271_p10 }
  0xb2   : > { %p3278_p6 = por %p3277_p4, %p3276_p3 }
  0xb4   : > { %p3279_p0 = pnand %p3278_p6, %p3272_p13 }
  0xb6   : > { %3282 = shalt.err (!%p3279_p0)
}
  0xb7   : > { %2854 = dma.hbm_to_vmem [thread:$0]  (!%p3587_p1), %s793_s10, 16, %s796_s4, %s3607_s0  }
  0xb8   : > { %816 = sbr.rel (%p3568_p11) target bundleno = 2559 (0x9ff), region = 100 }
  0xbd   : > { %3316 = dma.done.wait (%p3556_p7), [#allocation6], 64  }
  0xbe   : > { %3318 = vsyncadd (%p3556_p7), [#allocation6], 4294967232 }
  0xbf   : > { %3320 = dma.done.wait (%p3556_p7), [#allocation8], 16  }
  0xc0   : > { %3322 = vsyncadd (%p3556_p7), [#allocation8], 4294967280  ;;  %s4087_s24 = sld [smem:[#allocation26_spill]] }
  0xc1   : > { %s4089_s1 = sld [smem:[#allocation20_spill]] }
  0xc2   : > { %s4090_s18 = sld [smem:[#allocation30_spill]] }
  0xc6   : > { %s4088_s19 = sadd.s32 4294967295, %s4087_s24  }
  0xc7   : > { %s826_s0 = sand.u32 1, %s4088_s19   ;;  %s3724_s25 = sand.u32 1, %s4089_s1  }
  0xc8   : > { %s2797_s23 = smul.u32 3, %s3724_s25  ;;  %s827_s28 = scalar_lea.sflag [#allocation6], %s826_s0 }
  0xc9   : > { %p4091_p11 = scmp.ne.s32.totalorder %s4090_s18, 0 }
  0xca   : > { %s3727_s6 = scalar_lea.vmem [#allocation9], %s2797_s23 }
  0xcb   : > { %3324 = dma.done.wait (%p4091_p11), %s827_s28, 896  }
  0xcc   : > { %3326 = vsyncadd (%p4091_p11), %s827_s28, 4294966400  ;;  %s4092_s22 = sld [smem:[#allocation23_spill]]  ;;  %s2576_s2 = sshll.u32 %s3724_s25, 4 }
  0xcd   : > { %s4093_s17 = sld [smem:[#allocation22_spill]]  ;;  %s2577_s20 = sshll.u32 %s3724_s25, 5 }
  0xce   : > { %s4095_s29 = sld [smem:[#allocation32_spill]]  ;;  %s3782_s5 = scalar_lea.vmem [#allocation10], %s2576_s2 }
  0xcf   : > { %s4096_s18 = sld [smem:[#allocation34_spill]]  ;;  %s847_s9 = scalar_lea.vmem [#allocation11], %s3724_s25 }
  0xd0   : > { %s4098_s11 = sld [smem:[#allocation48_spill]]  ;;  %s880_s10 = scalar_lea.vmem [#allocation15], %s3724_s25 }
  0xd1   : > { %s4099_s4 = sld [smem:[#allocation38_spill]]  ;;  %s888_s16 = scalar_lea.vmem [#allocation16], %s3724_s25 }
  0xd2   : > { %p1004_p7 = scmp.lt.s32.totalorder %s4092_s22, 1  ;;  %s4100_s27 = sld [smem:[#allocation42_spill]] }
  0xd3   : > { %p1017_p1 = scmp.lt.s32.totalorder %s4093_s17, 1  ;;  %s4101_s1 = sld [smem:[#allocation49_spill]] }
  0xd4   : > { %s4126_s22 = smov (!%p1004_p7, %s4092_s22), 1  ;;  %s4102_s26 = sld [smem:[#allocation51_spill]] }
  0xd5   : > { %s3741_s3 = scalar_select %p1017_p1, %s4093_s17, 1 }
  0xd6   : > { %s2647_s30 = sshll.u32 %s4126_s22, 3  ;;  %s2648_s24 = sshll.u32 %s4126_s22, 4 }
  0xd7   : > { %s1008_s21 = scalar_lea.vmem %s4095_s29, %s2647_s30  ;;  %s3755_s0 = scalar_lea.vmem %s4096_s18, %s2648_s24 }
  0xd8   : > { %4097 = sst [smem:[#allocation31_spill]] %s3755_s0  ;;  %s2798_s23 = smul.u32 48, %s3741_s3 }
  0xd9   : > { %s2649_s28 = sshll.u32 %s3741_s3, 4  ;;  %s1029_s7 = scalar_lea.vmem %s4098_s11, %s3741_s3 }
  0xda   : > { %s3766_s12 = scalar_lea.vmem %s4099_s4, %s2798_s23  ;;  %s3771_s29 = scalar_lea.vmem %s4100_s27, %s2649_s28 }
  0xdb   : > { %s1032_s18 = scalar_lea.vmem %s4101_s1, %s3741_s3  ;;  %s3780_s0 = scalar_lea.vmem %s4102_s26, %s2648_s24 }
  0xdc   : > { %s855_s11 = scalar_lea.vmem [#allocation12], %s3724_s25  ;;  %s3786_s4 = scalar_lea.vmem [#allocation13], %s2577_s20 }
  0xdd   : > { %s872_s23 = scalar_lea.vmem [#allocation14], %s3724_s25  ;;  %p2587_p5 = scmp.ne.s32.totalorder %s4093_s17, 0 }
  0xde   : > { %s4103_s15 = sld [smem:[#allocation35_spill]] (!%p2587_p5) }
  0xdf   : > { %1042 = sbr.rel (%p2587_p5) target bundleno = 435 (0x1b3), region = 144 }
  0xe4   : > { %v1045_v1 = vld [vmem:[#allocation5] sm:$0xf]  ;;  %vm1062_vm0 = vcmask 1043456   ;;  %v3373_v2 = vmov 0.0   ;;  %vm3374_vm1 = vmmov 0   ;;  %vm1058_vm2 = vcmask 64512  }
  0xe5   : > { %2689 = vmatprep.subr.bf16.mxu0 %v3373_v2  ;;  %v1064_v3 = vsel %vm1062_vm0, %v1045_v1, 0  ;;  %2691 = vmatprep.mubr.msk.bf16.mxu0 %vm3374_vm1, %v3373_v2  ;;  %v2943_v4 = vld [vmem:[%s1008_s21] sm:$0xff]   ;;  %vm1111_vm3 = vcmask 261120   ;;  %v1108_v12 = vld [vmem:[%s4103_s15 + $0x8] sm:$0xff] }
  0xe6   : > { %2690 = vmatpush3.bf16.msra.mxu0 %v1064_v3  ;;  %v2588_v5 = vld [vmem:[#allocation7] ss:$0 sm:$0xff] }
  0xe7   : > { %v1107_v7 = vld [vmem:[%s4103_s15] sm:$0xff] }
  0xe9   : > { %2692 = vmatmul.mubr.msk.bf16.vlgmr.msra.gmra.mxu0 %vm1058_vm2, %v2943_v4 }
 0x1a9   : > { %v1100_v6 = vpop.f32.mrf.mxu0 }
 0x1aa   : > { %v1101_v8 = vadd.f32 %v2588_v5, %v1100_v6 }
 0x1ab   : > { %v2693_v9 = vpop.f32.mrf.mxu0 }
 0x1ac   : > { %v1109_v10 = vadd.f32 %v1107_v7, %v1101_v8 }
 0x1ad   : > { %v1103_v11 = vpop.f32.mrf.mxu0 }
 0x1ae   : > { %1112 = vst.msk [vmem:[#allocation2] sm:$0xff] %vm1111_vm3, %v1109_v10  ;;  %v1104_v13 = vadd.f32 %v2588_v5, %v1103_v11 }
 0x1af   : > { %v2694_v14 = vpop.f32.mrf.mxu0 }
 0x1b0   : > { %v1110_v15 = vadd.f32 %v1108_v12, %v1104_v13 }
 0x1b2   : > { %1113 = vst.msk [vmem:[#allocation2 + $0x8] sm:$0xff] %vm1111_vm3, %v1110_v15 }
 0x1b3 PF: > { %v2944_v16 = vld [vmem:[%s3766_s12 + $0x18] sm:$0xff]   ;;  %v3375_v17 = vmov 0.0   ;;  %v2945_v18 = vld [vmem:[%s3766_s12 + $0x8] sm:$0xff]   ;;  %v2946_v19 = vld [vmem:[%s3766_s12 + $0x10] sm:$0xff]   ;;  %vm3376_vm4 = vmmov 0   ;;  %vm1141_vm5 = vcmask 261120  }
 0x1b4   : > { %2703 = vmatprep.subr.bf16.mxu1 %v3375_v17  ;;  %2695 = vmatprep.subr.bf16.mxu0 %v3375_v17  ;;  %v2947_v20 = vld [vmem:[%s3766_s12] sm:$0xff]   ;;  %v2600_v26 = vld [vmem:[%s3727_s6 + $0x1] ss:$0 sm:$0xff]  ;;  %vm1327_vm6 = vcmask 64512   ;;  %s3377_s2 = smov 112   ;;  %s3378_s20 = smov 120  }
 0x1b5   : > { %2704 = vmatpush3.bf16.msra.mxu1 %v2944_v16  ;;  %2707 = vmatprep.mubr.msk.bf16.mxu1 %vm3376_vm4, %v3375_v17  ;;  %v3808_v21 = vld [vmem:[#allocation2] sm:$0xff]  ;;  %s3379_s21 = smov 104   ;;  %v2948_v41 = vld [vmem:[%s3766_s12 + $0x28] sm:$0xff]   ;;  %s4104_s28 = sld [smem:[#allocation33_spill]]  ;;  %vm1375_vm7 = vcmask 130048   ;;  %vm1577_vm8 = vcmask 130112  }
 0x1b6   : > { %2696 = vmatpush3.bf16.msra.mxu0 %v2945_v18  ;;  %2705 = vmatprep.subr.bf16.mxu1 %v3375_v17  ;;  %v2591_v27 = vld [vmem:[%s3727_s6] ss:$0 sm:$0xff]  ;;  %v2609_v61 = vld [vmem:[%s3727_s6 + $0x2] ss:$0 sm:$0xff]  ;;  %s3380_s6 = smov 8   ;;  %s3382_s30 = smov 24  }
 0x1b7   : > { %2697 = vmatprep.subr.bf16.mxu0 %v3375_v17  ;;  %2699 = vmatprep.mubr.msk.bf16.mxu0 %vm3376_vm4, %v3375_v17  ;;  %v2949_v42 = vld [vmem:[%s3766_s12 + $0x20] sm:$0xff]   ;;  %vm1709_vm9 = vcmask 195712   ;;  %vm1841_vm10 = vcmask 261312   ;;  %vm2094_vm13 = vcmask 523264   ;;  %s4108_s25 = sld [smem:[#allocation22_spill]] }
 0x1b9   : > { %v3810_v22 = vld [vmem:[#allocation2 + $0x8] sm:$0xff]  ;;  %2706 = vmatpush3.bf16.msra.mxu1 %v2946_v19 }
 0x1ba   : > { %v1116_v23 = vpack.c.bf16 %v3810_v22, %v3808_v21  ;;  %2698 = vmatpush3.bf16.msra.mxu0 %v2947_v20  ;;  %2719 = vmatprep.subr.bf16.mxu1 %v3375_v17 }
 0x1bb   : > { %2711 = vmatprep.subr.bf16.mxu0 %v3375_v17  ;;  %s4105_s8 = scalar_lea.vmem %s4104_s28, %s4126_s22  ;;  %s3381_s22 = smov 16  }
 0x1bc   : > { %2708 = vmatmul.mubr.msk.bf16.vlgmr.msra.gmra.mxu1 %vm1141_vm5, %v1116_v23  ;;  %v2613_v52 = vld [vmem:[%s4105_s8] ss:$0 sm:$0xff] }
 0x1bd   : > { %2700 = vmatmul.mubr.msk.bf16.vlgmr.msra.gmra.mxu0 %vm1141_vm5, %v1116_v23  ;;  %2721 = vmatprep.mubr.msk.bf16.mxu1 %vm3376_vm4, %v3375_v17  ;;  %p2640_p8 = scmp.ne.s32.totalorder %s4108_s25, 1 }
 0x1be   : > { %2715 = vmatprep.mubr.msk.bf16.mxu0 %vm3376_vm4, %v3375_v17  ;;  %2712 = vmatpush3.bf16.msra.mxu0 %v2948_v41  ;;  %s4109_s3 = sld [smem:[#allocation31_spill]] (!%p2640_p8) }
 0x1bf   : > { %2713 = vmatprep.subr.bf16.mxu0 %v3375_v17 }
 0x1c2   : > { %2714 = vmatpush3.bf16.msra.mxu0 %v2949_v42 }
 0x1c3   : > { %2725 = vmatprep.subr.bf16.mxu0 %v3375_v17 }
 0x1c5   : > { %2716 = vmatmul.mubr.msk.bf16.vlgmr.msra.gmra.mxu0 %vm1141_vm5, %v1116_v23 }
 0x1c6   : > { %2727 = vmatprep.mubr.msk.bf16.mxu0 %vm3376_vm4, %v3375_v17 }
 0x27c   : > { %v1245_v24 = vpop.f32.mrf.mxu1 }
 0x27d   : > { %v1179_v25 = vpop.f32.mrf.mxu0  ;;  %v1246_v31 = vadd.f32 %v2600_v26, %v1245_v24 }
 0x27e   : > { %v2709_v28 = vpop.f32.mrf.mxu1  ;;  %v1180_v32 = vadd.f32 %v2591_v27, %v1179_v25 }
 0x27f   : > { %v2701_v29 = vpop.f32.mrf.mxu0 }
 0x280   : > { %v1248_v30 = vpop.f32.mrf.mxu1 }
 0x281   : > { %v1249_v33 = vadd.f32 %v2600_v26, %v1248_v30  ;;  %v1182_v34 = vpop.f32.mrf.mxu0 }
 0x282   : > { %v1183_v35 = vadd.f32 %v2591_v27, %v1182_v34  ;;  %v2710_v36 = vpop.f32.mrf.mxu1 }
 0x283   : > { %v1319_v37 = vpack.c.bf16 %v1249_v33, %v1246_v31  ;;  %v2702_v38 = vpop.f32.mrf.mxu0 }
 0x284   : > { %v1318_v39 = vpack.c.bf16 %v1183_v35, %v1180_v32 }
 0x285   : > { %1582 = vrot.lane.b32.xlu1 %v1319_v37, %s3377_s2  ;;  %1449 = vrot.lane.b32.xlu0 %v1319_v37, %s3378_s20  ;;  %v1332_v40 = vsel %vm1327_vm6, %v1319_v37, 0  ;;  %v1311_v62 = vpop.f32.mrf.mxu0 }
 0x286   : > { %2720 = vmatpush3.bf16.xpose.msra.mxu1 %v1332_v40  ;;  %v1312_v0 = vadd.f32 %v2609_v61, %v1311_v62 }
 0x287   : > { %2731 = vmatprep.subr.bf16.mxu1 %v3375_v17  ;;  %v2717_v63 = vpop.f32.mrf.mxu0 }
 0x289   : > { %1580 = vrot.lane.b32.xlu1 %v1318_v39, %s3377_s2  ;;  %1446 = vrot.lane.b32.xlu0 %v1318_v39, %s3378_s20  ;;  %v1314_v1 = vpop.f32.mrf.mxu0 }
 0x28a   : > { %v1315_v2 = vadd.f32 %v2609_v61, %v1314_v1 }
 0x28b   : > { %v2718_v3 = vpop.f32.mrf.mxu0 }
 0x28c   : > { %v3867_v4 = vpack.c.bf16 %v1315_v2, %v1312_v0 }
 0x28d   : > { %1712 = vrot.lane.b32.xlu1 %v1318_v39, %s3379_s21  ;;  %1714 = vrot.lane.b32.xlu0 %v1319_v37, %s3379_s21 }
 0x28e   : > { %2722 = vmatmul.mubr.msk.bf16.vlgmr.msra.gmra.mxu1 %vm1327_vm6, %v1318_v39  ;;  %2726 = vmatpush3.bf16.msra.mxu0 %v3867_v4 }
 0x28f   : > { %2733 = vmatprep.mubr.msk.bf16.mxu1 %vm3376_vm4, %v3375_v17  ;;  %2737 = vmatprep.subr.bf16.mxu0 %v3375_v17 }
 0x2f7   : > { %v1450_v43 = vpop.permute.xlu0 %1449  ;;  %v1583_v45 = vpop.permute.xlu1 %1582 }
 0x2f8   : > { %v1455_v44 = vsel %vm1327_vm6, %v1450_v43, 0  ;;  %v1588_v47 = vsel %vm1327_vm6, %v1583_v45, 0 }
 0x2f9   : > { %2732 = vmatpush3.bf16.xpose.msra.mxu1 %v1455_v44 }
 0x2fa   : > { %2743 = vmatprep.subr.bf16.mxu1 %v3375_v17 }
 0x2fb   : > { %v1447_v46 = vpop.permute.xlu0 %1446  ;;  %v1581_v49 = vpop.permute.xlu1 %1580 }
 0x2ff   : > { %v1715_v48 = vpop.permute.xlu0 %1714  ;;  %v1713_v51 = vpop.permute.xlu1 %1712 }
 0x300   : > { %2734 = vmatmul.mubr.msk.bf16.vlgmr.msra.gmra.mxu1 %vm1327_vm6, %v1447_v46  ;;  %v1720_v50 = vsel %vm1327_vm6, %v1715_v48, 0 }
 0x301   : > { %2744 = vmatpush3.bf16.xpose.msra.mxu1 %v1588_v47  ;;  %2745 = vmatprep.mubr.msk.bf16.mxu1 %vm3376_vm4, %v3375_v17 }
 0x302   : > { %2755 = vmatprep.subr.bf16.mxu1 %v3375_v17 }
 0x308   : > { %2746 = vmatmul.mubr.msk.bf16.vlgmr.msra.gmra.mxu1 %vm1327_vm6, %v1581_v49 }
 0x309   : > { %2756 = vmatpush3.bf16.xpose.msra.mxu1 %v1720_v50  ;;  %2757 = vmatprep.mubr.msk.bf16.mxu1 %vm3376_vm4, %v3375_v17 }
 0x30a   : > { %2767 = vmatprep.subr.bf16.mxu1 %v3375_v17 }
 0x310   : > { %2758 = vmatmul.mubr.msk.bf16.vlgmr.msra.gmra.mxu1 %vm1327_vm6, %v1713_v51 }
 0x311   : > { %2771 = vmatprep.mubr.msk.bf16.mxu1 %vm3376_vm4, %v3375_v17 }
 0x34e   : > { %v1368_v53 = vpop.f32.mrf.mxu1 }
 0x34f   : > { %v1369_v54 = vadd.f32 %v2613_v52, %v1368_v53 }
 0x350   : > { %v2723_v55 = vpop.f32.mrf.mxu1 }
 0x351   : > { %v1376_v56 = vsel %vm1375_vm7, %v1369_v54, -inf }
 0x352   : > { %1377 = vmax.xlane.f32.xlu0 %v1376_v56  ;;  %v1371_v57 = vpop.f32.mrf.mxu1 }
 0x353   : > { %v1372_v58 = vadd.f32 %v2613_v52, %v1371_v57 }
 0x354   : > { %v2724_v59 = vpop.f32.mrf.mxu1 }
 0x355   : > { %v1379_v60 = vsel %vm1375_vm7, %v1372_v58, -inf }
 0x356   : > { %1380 = vmax.xlane.f32.xlu1 %v1379_v60 }
 0x3c0   : > { %v1491_v5 = vpop.f32.mrf.mxu1 }
 0x3c1   : > { %v1492_v6 = vadd.f32 %v2613_v52, %v1491_v5 }
 0x3c2   : > { %v2735_v7 = vpop.f32.mrf.mxu1 }
 0x3c3   : > { %v1498_v8 = vsel %vm1375_vm7, %v1492_v6, -inf }
 0x3c4   : > { %1499 = vmax.xlane.f32.xlu0 %v1498_v8  ;;  %v1494_v9 = vpop.f32.mrf.mxu1 }
 0x3c5   : > { %v1495_v10 = vadd.f32 %v2613_v52, %v1494_v9 }
 0x3c6   : > { %v2736_v11 = vpop.f32.mrf.mxu1 }
 0x3c7   : > { %v1501_v12 = vsel %vm1375_vm7, %v1495_v10, -inf }
 0x3c8   : > { %1502 = vmax.xlane.f32.xlu0 %v1501_v12  ;;  %v1624_v13 = vpop.f32.mrf.mxu1 }
 0x3c9   : > { %v1625_v14 = vadd.f32 %v2613_v52, %v1624_v13 }
 0x3ca   : > { %v2747_v15 = vpop.f32.mrf.mxu1 }
 0x3cb   : > { %v1631_v16 = vsel %vm1375_vm7, %v1625_v14, -inf }
 0x3cc   : > { %1632 = vmax.xlane.f32.xlu1 %v1631_v16  ;;  %v1627_v18 = vpop.f32.mrf.mxu1 }
 0x3cd   : > { %v1628_v19 = vadd.f32 %v2613_v52, %v1627_v18 }
 0x3ce   : > { %v2748_v20 = vpop.f32.mrf.mxu1 }
 0x3cf   : > { %v1634_v23 = vsel %vm1375_vm7, %v1628_v19, -inf }
 0x3d0   : > { %1635 = vmax.xlane.f32.xlu0 %v1634_v23  ;;  %v1756_v24 = vpop.f32.mrf.mxu1 }
 0x3d1   : > { %v1757_v25 = vadd.f32 %v2613_v52, %v1756_v24 }
 0x3d2   : > { %v2759_v26 = vpop.f32.mrf.mxu1 }
 0x3d3   : > { %v1763_v27 = vsel %vm1375_vm7, %v1757_v25, -inf }
 0x3d4   : > { %1764 = vmax.xlane.f32.xlu1 %v1763_v27  ;;  %v1759_v28 = vpop.f32.mrf.mxu1 }
 0x3d5   : > { %v1760_v29 = vadd.f32 %v2613_v52, %v1759_v28 }
 0x3d6   : > { %v2760_v30 = vpop.f32.mrf.mxu1 }
 0x3d7   : > { %v1766_v31 = vsel %vm1375_vm7, %v1760_v29, -inf }
 0x3d8   : > { %1767 = vmax.xlane.f32.xlu0 %v1766_v31 }
 0x3db   : > { %v1378_v32 = vpop.xlane.xlu0 %1377 }
 0x3dc   : > { %v1382_v33 = vsub.f32 %v1369_v54, %v1378_v32 }
 0x3de   : > { %v1384_v34 = vmul.f32 1.442695, %v1382_v33 }
 0x3df   : > { %v1381_v35 = vpop.xlane.xlu1 %1380 }
 0x3e0   : > { %2958 = vpow2.f32 %v1384_v34  ;;  %v1383_v36 = vsub.f32 %v1372_v58, %v1381_v35 }
 0x3e2   : > { %v1386_v37 = vmul.f32 1.442695, %v1383_v36 }
 0x3e4   : > { %2960 = vpow2.f32 %v1386_v37 }
 0x3ed   : > { %v2959_v38 = vpop.eup %2958 }
 0x3ee   : > { %v1388_v39 = vsel %vm1375_vm7, %v2959_v38, 0.0 }
 0x3ef   : > { %1389 = vadd.xlane.f32.xlu1 %v1388_v39 }
 0x3f1   : > { %v2961_v40 = vpop.eup %2960 }
 0x3f2   : > { %v1391_v41 = vsel %vm1375_vm7, %v2961_v40, 0.0 }
 0x3f3   : > { %1392 = vadd.xlane.f32.xlu0 %v1391_v41 }
 0x400   : > { %1522 = vrot.lane.b32.xlu1 %v3867_v4, %s3378_s20 }
 0x44d   : > { %v1500_v42 = vpop.xlane.xlu0 %1499 }
 0x44e   : > { %v1504_v43 = vsub.f32 %v1492_v6, %v1500_v42 }
 0x450   : > { %v1506_v44 = vmul.f32 1.442695, %v1504_v43 }
 0x451   : > { %v1503_v45 = vpop.xlane.xlu0 %1502 }
 0x452   : > { %2962 = vpow2.f32 %v1506_v44  ;;  %v1505_v46 = vsub.f32 %v1495_v10, %v1503_v45 }
 0x454   : > { %v1508_v47 = vmul.f32 1.442695, %v1505_v46 }
 0x455   : > { %v1633_v48 = vpop.xlane.xlu1 %1632 }
 0x456   : > { %2964 = vpow2.f32 %v1508_v47  ;;  %v1637_v49 = vsub.f32 %v1625_v14, %v1633_v48 }
 0x458   : > { %v1639_v50 = vmul.f32 1.442695, %v1637_v49 }
 0x459   : > { %v1636_v51 = vpop.xlane.xlu0 %1635 }
 0x45a   : > { %2966 = vpow2.f32 %v1639_v50  ;;  %v1638_v52 = vsub.f32 %v1628_v19, %v1636_v51  ;;  %v2950_v51 = vld [vmem:[%s3782_s5 + $0x8] sm:$0xff]  }
 0x45b   : > { %2768 = vmatpush3.bf16.msra.mxu1 %v2950_v51 }
 0x45c   : > { %v1641_v53 = vmul.f32 1.442695, %v1638_v52  ;;  %2769 = vmatprep.subr.bf16.mxu1 %v3375_v17 }
 0x45d   : > { %v1765_v54 = vpop.xlane.xlu1 %1764 }
 0x45e   : > { %2968 = vpow2.f32 %v1641_v53  ;;  %v1769_v55 = vsub.f32 %v1757_v25, %v1765_v54  ;;  %v2951_v53 = vld [vmem:[%s3782_s5] sm:$0xff]  }
 0x45f   : > { %v2963_v56 = vpop.eup %2962  ;;  %2770 = vmatpush3.bf16.msra.mxu1 %v2951_v53 }
 0x460   : > { %v1771_v57 = vmul.f32 1.442695, %v1769_v55  ;;  %v1510_v58 = vsel %vm1375_vm7, %v2963_v56, 0.0  ;;  %2783 = vmatprep.subr.bf16.mxu1 %v3375_v17 }
 0x461   : > { %v1768_v59 = vpop.xlane.xlu0 %1767  ;;  %1511 = vadd.xlane.f32.xlu1 %v1510_v58 }
 0x462   : > { %2970 = vpow2.f32 %v1771_v57  ;;  %v1770_v60 = vsub.f32 %v1760_v29, %v1768_v59 }
 0x463   : > { %v2965_v61 = vpop.eup %2964 }
 0x464   : > { %v1773_v62 = vmul.f32 1.442695, %v1770_v60  ;;  %v1513_v63 = vsel %vm1375_vm7, %v2965_v61, 0.0 }
 0x465   : > { %1514 = vadd.xlane.f32.xlu0 %v1513_v63 }
 0x466   : > { %2972 = vpow2.f32 %v1773_v62 }
 0x467   : > { %v2967_v0 = vpop.eup %2966 }
 0x468   : > { %v1643_v1 = vsel %vm1375_vm7, %v2967_v0, 0.0 }
 0x469   : > { %1644 = vadd.xlane.f32.xlu1 %v1643_v1 }
 0x46b   : > { %v2969_v2 = vpop.eup %2968 }
 0x46c   : > { %v1646_v3 = vsel %vm1375_vm7, %v2969_v2, 0.0 }
 0x46d   : > { %1647 = vadd.xlane.f32.xlu0 %v1646_v3 }
 0x46f   : > { %v2971_v5 = vpop.eup %2970 }
 0x470   : > { %v1775_v6 = vsel %vm1375_vm7, %v2971_v5, 0.0 }
 0x471   : > { %1776 = vadd.xlane.f32.xlu1 %v1775_v6  ;;  %v2952_v6 = vld [vmem:[%s3771_s29 + $0x8] sm:$0xff]  }
 0x473   : > { %v2973_v7 = vpop.eup %2972 }
 0x474   : > { %v1778_v8 = vsel %vm1375_vm7, %v2973_v7, 0.0 }
 0x475   : > { %1779 = vadd.xlane.f32.xlu0 %v1778_v8  ;;  %v2622_v8 = vld [vmem:[%s847_s9] ss:$0 sm:$0xff] }
 0x478   : > { %v1390_v9 = vpop.xlane.xlu1 %1389 }
 0x479   : > { %2974 = vrcp.f32 %v1390_v9 }
 0x47c   : > { %v1393_v10 = vpop.xlane.xlu0 %1392  ;;  %v1523_v16 = vpop.permute.xlu1 %1522 }
 0x47d   : > { %2976 = vrcp.f32 %v1393_v10 }
 0x482   : > { %1786 = vrot.lane.b32.xlu1 %v3867_v4, %s3379_s21 }
 0x486   : > { %v2975_v11 = vpop.eup %2974 }
 0x487   : > { %v1396_v13 = vmul.f32 %v2975_v11, %v2959_v38 }
 0x48a   : > { %v2977_v12 = vpop.eup %2976 }
 0x48b   : > { %1654 = vrot.lane.b32.xlu0 %v3867_v4, %s3377_s2  ;;  %v1397_v14 = vmul.f32 %v2977_v12, %v2961_v40 }
 0x48d   : > { %v1398_v15 = vpack.c.bf16 %v1397_v14, %v1396_v13  ;;  %v2626_v13 = vld [vmem:[%s880_s10] ss:$0 sm:$0xff] }
 0x48f   : > { %2728 = vmatmul.mubr.msk.bf16.vlgmr.msra.gmra.mxu0 %vm1375_vm7, %v1398_v15 }
 0x490   : > { %2738 = vmatpush3.bf16.msra.mxu0 %v1523_v16  ;;  %2739 = vmatprep.mubr.msk.bf16.mxu0 %vm3376_vm4, %v3375_v17 }
 0x491   : > { %2749 = vmatprep.subr.bf16.mxu0 %v3375_v17 }
 0x4ea   : > { %v1512_v18 = vpop.xlane.xlu1 %1511 }
 0x4eb   : > { %2978 = vrcp.f32 %v1512_v18 }
 0x4ee   : > { %v1515_v19 = vpop.xlane.xlu0 %1514 }
 0x4ef   : > { %2980 = vrcp.f32 %v1515_v19 }
 0x4f2   : > { %v1645_v20 = vpop.xlane.xlu1 %1644 }
 0x4f3   : > { %2982 = vrcp.f32 %v1645_v20  ;;  %v2627_v20 = vld [vmem:[%s888_s16] ss:$0 sm:$0xff] }
 0x4f6   : > { %v1648_v23 = vpop.xlane.xlu0 %1647 }
 0x4f7   : > { %2984 = vrcp.f32 %v1648_v23 }
 0x4f8   : > { %v2979_v4 = vpop.eup %2978 }
 0x4f9   : > { %v1518_v26 = vmul.f32 %v2979_v4, %v2963_v56 }
 0x4fa   : > { %v1777_v24 = vpop.xlane.xlu1 %1776 }
 0x4fb   : > { %2986 = vrcp.f32 %v1777_v24 }
 0x4fc   : > { %v2981_v25 = vpop.eup %2980 }
 0x4fd   : > { %v1519_v27 = vmul.f32 %v2981_v25, %v2965_v61  ;;  %v2954_v25 = vld [vmem:[%s3786_s4 + $0x18] sm:$0xff]  }
 0x4fe   : > { %v1780_v28 = vpop.xlane.xlu0 %1779  ;;  %v1787_v36 = vpop.permute.xlu1 %1786 }
 0x4ff   : > { %2988 = vrcp.f32 %v1780_v28  ;;  %v1520_v29 = vpack.c.bf16 %v1519_v27, %v1518_v26  ;;  %v2955_v26 = vld [vmem:[%s3786_s4 + $0x10] sm:$0xff]   ;;  %v2957_v27 = vld [vmem:[%s3786_s4] sm:$0xff]   ;;  %v2628_v28 = vld [vmem:[%s855_s11] ss:$0 sm:$0xff]  ;;  %s4110_s11 = sld [smem:[#allocation50_spill]] (!%p2640_p8) }
 0x500   : > { %v2983_v30 = vpop.eup %2982 }
 0x501   : > { %2740 = vmatmul.mubr.msk.bf16.vlgmr.msra.gmra.mxu0 %vm1375_vm7, %v1520_v29  ;;  %v1651_v33 = vmul.f32 %v2983_v30, %v2967_v0 }
 0x502   : > { %v1655_v31 = vpop.permute.xlu0 %1654  ;;  %2751 = vmatprep.mubr.msk.bf16.mxu0 %vm3376_vm4, %v3375_v17 }
 0x503   : > { %2750 = vmatpush3.bf16.msra.mxu0 %v1655_v31 }
 0x504   : > { %v2985_v32 = vpop.eup %2984  ;;  %2761 = vmatprep.subr.bf16.mxu0 %v3375_v17 }
 0x505   : > { %v1652_v34 = vmul.f32 %v2985_v32, %v2969_v2 }
 0x507   : > { %v1653_v35 = vpack.c.bf16 %v1652_v34, %v1651_v33 }
 0x508   : > { %v2987_v37 = vpop.eup %2986 }
 0x509   : > { %2752 = vmatmul.mubr.msk.bf16.vlgmr.msra.gmra.mxu0 %vm1375_vm7, %v1653_v35  ;;  %v1783_v39 = vmul.f32 %v2987_v37, %v2971_v5 }
 0x50a   : > { %2762 = vmatpush3.bf16.msra.mxu0 %v1787_v36  ;;  %2763 = vmatprep.mubr.msk.bf16.mxu0 %vm3376_vm4, %v3375_v17 }
 0x50b   : > { %2775 = vmatprep.subr.bf16.mxu0 %v3375_v17 }
 0x50c   : > { %v2989_v38 = vpop.eup %2988 }
 0x50d   : > { %v1784_v40 = vmul.f32 %v2989_v38, %v2973_v7  ;;  %v2953_v7 = vld [vmem:[%s3771_s29] sm:$0xff]  }
 0x50f   : > { %v1785_v41 = vpack.c.bf16 %v1784_v40, %v1783_v39 }
 0x511   : > { %2764 = vmatmul.mubr.msk.bf16.vlgmr.msra.gmra.mxu0 %vm1375_vm7, %v1785_v41 }
 0x512   : > { %2779 = vmatprep.mubr.msk.bf16.mxu0 %vm3376_vm4, %v3375_v17  ;;  %2776 = vmatpush3.bf16.msra.mxu0 %v2952_v6 }
 0x513   : > { %2777 = vmatprep.subr.bf16.mxu0 %v3375_v17 }
 0x516   : > { %2778 = vmatpush3.bf16.msra.mxu0 %v2953_v7 }
 0x54f   : > { %v1436_v42 = vpop.f32.mrf.mxu0 }
 0x550   : > { %1443 = vst.msk [vmem:[#allocation3] sm:$0xff] %vm1327_vm6, %v1436_v42 }
 0x551   : > { %v2729_v43 = vpop.f32.mrf.mxu0 }
 0x553   : > { %v1439_v44 = vpop.f32.mrf.mxu0 }
 0x554   : > { %1444 = vst.msk [vmem:[#allocation3 + $0x8] sm:$0xff] %vm1327_vm6, %v1439_v44 }
 0x555   : > { %v2730_v45 = vpop.f32.mrf.mxu0 }
 0x5c1   : > { %v1562_v46 = vpop.f32.mrf.mxu0 }
 0x5c2   : > { %1571 = vrot.lane.b32.xlu1 %v1562_v46, %s3380_s6 }
 0x5c3   : > { %v2741_v47 = vpop.f32.mrf.mxu0 }
 0x5c5   : > { %v1565_v48 = vpop.f32.mrf.mxu0 }
 0x5c6   : > { %1573 = vrot.lane.b32.xlu0 %v1565_v48, %s3380_s6 }
 0x5c7   : > { %v2742_v49 = vpop.f32.mrf.mxu0 }
 0x5c9   : > { %v1694_v50 = vpop.f32.mrf.mxu0 }
 0x5ca   : > { %1703 = vrot.lane.b32.xlu1 %v1694_v50, %s3381_s22 }
 0x5cb   : > { %v2753_v52 = vpop.f32.mrf.mxu0 }
 0x5cd   : > { %v1697_v54 = vpop.f32.mrf.mxu0 }
 0x5ce   : > { %1705 = vrot.lane.b32.xlu0 %v1697_v54, %s3381_s22 }
 0x5cf   : > { %v2754_v55 = vpop.f32.mrf.mxu0 }
 0x5d1   : > { %v1826_v56 = vpop.f32.mrf.mxu0 }
 0x5d2   : > { %1835 = vrot.lane.b32.xlu1 %v1826_v56, %s3382_s30 }
 0x5d3   : > { %v2765_v57 = vpop.f32.mrf.mxu0 }
 0x5d5   : > { %v1829_v58 = vpop.f32.mrf.mxu0 }
 0x5d6   : > { %1837 = vrot.lane.b32.xlu0 %v1829_v58, %s3382_s30 }
 0x5d7   : > { %v2766_v59 = vpop.f32.mrf.mxu0 }
 0x634   : > { %v1572_v60 = vpop.permute.xlu1 %1571 }
 0x635   : > { %1578 = vst.msk [vmem:[#allocation3] sm:$0xff] %vm1577_vm8, %v1572_v60 }
 0x638   : > { %v1574_v61 = vpop.permute.xlu0 %1573 }
 0x639   : > { %1579 = vst.msk [vmem:[#allocation3 + $0x8] sm:$0xff] %vm1577_vm8, %v1574_v61 }
 0x63c   : > { %v1704_v62 = vpop.permute.xlu1 %1703 }
 0x63d   : > { %1710 = vst.msk [vmem:[#allocation3] sm:$0xff] %vm1709_vm9, %v1704_v62 }
 0x640   : > { %v1706_v63 = vpop.permute.xlu0 %1705 }
 0x641   : > { %1711 = vst.msk [vmem:[#allocation3 + $0x8] sm:$0xff] %vm1709_vm9, %v1706_v63 }
 0x644   : > { %v1836_v0 = vpop.permute.xlu1 %1835 }
 0x645   : > { %1842 = vst.msk [vmem:[#allocation3] sm:$0xff] %vm1841_vm10, %v1836_v0 }
 0x648   : > { %v1838_v1 = vpop.permute.xlu0 %1837 }
 0x649   : > { %1843 = vst.msk [vmem:[#allocation3 + $0x8] sm:$0xff] %vm1841_vm10, %v1838_v1 }
 0x64c   : > { %v1844_v2 = vld [vmem:[#allocation3] sm:$0xff] }
 0x650   : > { %v1845_v3 = vld [vmem:[#allocation3 + $0x8] sm:$0xff] }
 0x651   : > { %v1846_v5 = vpack.c.bf16 %v1845_v3, %v1844_v2 }
 0x653   : > { %2772 = vmatmul.mubr.msk.bf16.vlgmr.msra.gmra.mxu1 %vm1141_vm5, %v1846_v5 }
 0x654   : > { %2791 = vmatprep.mubr.msk.bf16.mxu1 %vm3376_vm4, %v3375_v17  ;;  %2784 = vmatpush3.bf16.msra.mxu1 %v2954_v25 }
 0x655   : > { %2785 = vmatprep.subr.bf16.mxu1 %v3375_v17 }
 0x658   : > { %2786 = vmatpush3.bf16.msra.mxu1 %v2955_v26  ;;  %v2632_v26 = vld [vmem:[%s872_s23] ss:$0 sm:$0xff] }
 0x659   : > { %2787 = vmatprep.subr.bf16.mxu1 %v3375_v17 }
 0x713   : > { %v1907_v9 = vpop.f32.mrf.mxu1 }
 0x714   : > { %v1908_v10 = vadd.f32 %v2622_v8, %v1907_v9  ;;  %v3383_v9 = vmov -1.0  }
 0x715   : > { %v2773_v11 = vpop.f32.mrf.mxu1 }
 0x716   : > { %v1914_v12 = vadd.f32 %v1908_v10, %v3808_v21 }
 0x717   : > { %v1910_v14 = vpop.f32.mrf.mxu1 }
 0x718   : > { %v1911_v15 = vadd.f32 %v2622_v8, %v1910_v14  ;;  %v1923_v18 = vmul.f32 %v2626_v13, %v1914_v12 }
 0x719   : > { %v2774_v16 = vpop.f32.mrf.mxu1 }
 0x71a   : > { %v1915_v19 = vadd.f32 %v1911_v15, %v3810_v22  ;;  %v3926_v4 = vadd.f32 %v2627_v20, %v1923_v18  ;;  %v2956_v22 = vld [vmem:[%s3786_s4 + $0x8] sm:$0xff]  }
 0x71b   : > { %2788 = vmatpush3.bf16.msra.mxu1 %v2956_v22 }
 0x71c   : > { %v1924_v23 = vmul.f32 %v2626_v13, %v1915_v19  ;;  %2789 = vmatprep.subr.bf16.mxu1 %v3375_v17 }
 0x71e   : > { %v3928_v24 = vadd.f32 %v2627_v20, %v1924_v23 }
 0x71f   : > { %2790 = vmatpush3.bf16.msra.mxu1 %v2957_v27 }
 0x720   : > { %v1934_v21 = vpack.c.bf16 %v3928_v24, %v3926_v4 }
 0x722   : > { %2780 = vmatmul.mubr.msk.bf16.vlgmr.msra.gmra.mxu0 %vm1141_vm5, %v1934_v21 }
 0x7e2   : > { %v1995_v29 = vpop.f32.mrf.mxu0 }
 0x7e3   : > { %v1996_v30 = vadd.f32 %v2628_v28, %v1995_v29 }
 0x7e4   : > { %v2781_v31 = vpop.f32.mrf.mxu0 }
 0x7e5   : > { %v2004_v32 = vmul.f32 0.70710677, %v1996_v30  ;;  %v2002_v18 = vmul.f32 0.5, %v1996_v30  ;;  %v2639_v30 = vld [vmem:[%s1032_s18] ss:$0 sm:$0xff] }
 0x7e6   : > { %v1998_v33 = vpop.f32.mrf.mxu0 }
 0x7e7   : > { %v2010_v34 = vand.u32 2147483647, %v2004_v32  ;;  %v1999_v35 = vadd.f32 %v2628_v28, %v1998_v33  ;;  %vm2006_vm11 = vcmp.ge.f32.partialorder %v2004_v32, 0.0  ;;  %v2638_v28 = vld [vmem:[%s1029_s7] ss:$0 sm:$0xff] }
 0x7e8   : > { %v2782_v36 = vpop.f32.mrf.mxu0  ;;  %v2008_v10 = vsel %vm2006_vm11, 1.0, %v3383_v9 }
 0x7e9   : > { %v2012_v37 = vmul.f32 0.3275911, %v2010_v34  ;;  %v2005_v38 = vmul.f32 0.70710677, %v1999_v35  ;;  %v2036_v17 = vsub.f32 0.0, %v2010_v34  ;;  %v2003_v19 = vmul.f32 0.5, %v1999_v35 }
 0x7eb   : > { %v2014_v39 = vadd.f32 1.0, %v2012_v37  ;;  %v2011_v40 = vand.u32 2147483647, %v2005_v38  ;;  %v2038_v43 = vmul.f32 %v2036_v17, %v2010_v34  ;;  %vm2007_vm12 = vcmp.ge.f32.partialorder %v2005_v38, 0.0 }
 0x7ec   : > { %v2009_v14 = vsel %vm2007_vm12, 1.0, %v3383_v9 }
 0x7ed   : > { %2990 = vrcp.f32 %v2014_v39  ;;  %v2013_v41 = vmul.f32 0.3275911, %v2011_v40  ;;  %v2037_v44 = vsub.f32 0.0, %v2011_v40  ;;  %v2040_v47 = vmul.f32 1.442695, %v2038_v43 }
 0x7ef   : > { %v2015_v42 = vadd.f32 1.0, %v2013_v41  ;;  %v2039_v48 = vmul.f32 %v2037_v44, %v2011_v40 }
 0x7f1   : > { %2992 = vrcp.f32 %v2015_v42  ;;  %v2042_v53 = vmul.f32 1.442695, %v2039_v48 }
 0x7f2   : > { %2994 = vpow2.f32 %v2040_v47 }
 0x7f3   : > { %2996 = vpow2.f32 %v2042_v53 }
 0x7fa   : > { %v2991_v45 = vpop.eup %2990 }
 0x7fb   : > { %v2018_v46 = vmul.f32 1.0614054, %v2991_v45 }
 0x7fd   : > { %v2020_v49 = vadd.f32 -1.4531521, %v2018_v46 }
 0x7fe   : > { %v2993_v50 = vpop.eup %2992 }
 0x7ff   : > { %v2022_v51 = vmul.f32 %v2991_v45, %v2020_v49  ;;  %v2019_v52 = vmul.f32 1.0614054, %v2993_v50  ;;  %v2995_v2 = vpop.eup %2994 }
 0x800   : > { %v2997_v8 = vpop.eup %2996 }
 0x801   : > { %v2024_v54 = vadd.f32 1.4214138, %v2022_v51  ;;  %v2021_v55 = vadd.f32 -1.4531521, %v2019_v52 }
 0x803   : > { %v2026_v56 = vmul.f32 %v2991_v45, %v2024_v54  ;;  %v2023_v57 = vmul.f32 %v2993_v50, %v2021_v55 }
 0x805   : > { %v2028_v58 = vadd.f32 -0.28449672, %v2026_v56  ;;  %v2025_v59 = vadd.f32 1.4214138, %v2023_v57 }
 0x807   : > { %v2030_v60 = vmul.f32 %v2991_v45, %v2028_v58  ;;  %v2027_v61 = vmul.f32 %v2993_v50, %v2025_v59 }
 0x809   : > { %v2032_v62 = vadd.f32 0.2548296, %v2030_v60  ;;  %v2029_v63 = vadd.f32 -0.28449672, %v2027_v61 }
 0x80b   : > { %v2034_v0 = vmul.f32 %v2991_v45, %v2032_v62  ;;  %v2031_v1 = vmul.f32 %v2993_v50, %v2029_v63 }
 0x80d   : > { %v2044_v3 = vmul.f32 %v2995_v2, %v2034_v0  ;;  %v2033_v5 = vadd.f32 0.2548296, %v2031_v1 }
 0x80f   : > { %v2046_v6 = vsub.f32 1.0, %v2044_v3  ;;  %v2035_v7 = vmul.f32 %v2993_v50, %v2033_v5 }
 0x811   : > { %v2048_v11 = vmul.f32 %v2046_v6, %v2008_v10  ;;  %v2045_v12 = vmul.f32 %v2997_v8, %v2035_v7 }
 0x813   : > { %v2047_v13 = vsub.f32 1.0, %v2045_v12  ;;  %v2050_v15 = vadd.f32 1.0, %v2048_v11 }
 0x815   : > { %v2049_v16 = vmul.f32 %v2047_v13, %v2009_v14  ;;  %v2052_v23 = vmul.f32 %v2050_v15, %v2002_v18 }
 0x817   : > { %v2051_v20 = vadd.f32 1.0, %v2049_v16 }
 0x819   : > { %v2053_v21 = vmul.f32 %v2051_v20, %v2003_v19 }
 0x81b   : > { %v2054_v25 = vpack.c.bf16 %v2053_v21, %v2052_v23 }
 0x81d   : > { %2792 = vmatmul.mubr.msk.bf16.vlgmr.msra.gmra.mxu1 %vm2094_vm13, %v2054_v25 }
 0x8dd   : > { %v2132_v22 = vpop.f32.mrf.mxu1 }
 0x8de   : > { %v2133_v27 = vadd.f32 %v2632_v26, %v2132_v22 }
 0x8df   : > { %v2793_v29 = vpop.f32.mrf.mxu1 }
 0x8e0   : > { %v2139_v31 = vadd.f32 %v2133_v27, %v3926_v4 }
 0x8e1   : > { %v2135_v32 = vpop.f32.mrf.mxu1 }
 0x8e2   : > { %v2148_v33 = vmul.f32 %v2638_v28, %v2139_v31  ;;  %v2136_v34 = vadd.f32 %v2632_v26, %v2135_v32 }
 0x8e3   : > { %v2794_v35 = vpop.f32.mrf.mxu1 }
 0x8e4   : > { %v3955_v36 = vadd.f32 %v2639_v30, %v2148_v33  ;;  %v2140_v37 = vadd.f32 %v2136_v34, %v3928_v24 }
 0x8e6   : > { %2159 = vst.msk [vmem:[#allocation2] sm:$0xff] %vm1141_vm5, %v3955_v36  ;;  %v2149_v38 = vmul.f32 %v2638_v28, %v2140_v37  ;;  %2164 = sbr.rel (%p2640_p8) target bundleno = 2559 (0x9ff), region = 148 }
 0x8e8   : > { %v3960_v39 = vadd.f32 %v2639_v30, %v2149_v38 }
 0x8ea   : > { %2160 = vst.msk [vmem:[#allocation2 + $0x8] sm:$0xff] %vm1141_vm5, %v3960_v39 }
 0x8eb   : > { %v2217_v4 = vld [vmem:[%s4109_s3] sm:$0xff]  ;;  %v3384_v40 = vmov 0   ;;  %v2218_v41 = vld [vmem:[%s4109_s3 + $0x8] sm:$0xff]  ;;  %v2167_v24 = vmul.f32 0.70710677, %v3955_v36  ;;  %v3385_v16 = vmov -1.0  }
 0x8ec   : > { %2998 = vset.pattern.permute.xlu0 %v3384_v40  ;;  %v2168_v17 = vmul.f32 0.70710677, %v3960_v39  ;;  %v2165_v21 = vmul.f32 0.5, %v3955_v36  ;;  %v2166_v27 = vmul.f32 0.5, %v3960_v39  ;;  %v2641_v31 = vld [vmem:[%s4110_s11] ss:$0 sm:$0xff] }
 0x8ed   : > { %2221 = vperm.xlu0 %2998, %v2217_v4   ;;  %v2173_v42 = vand.u32 2147483647, %v2167_v24  ;;  %vm2169_vm14 = vcmp.ge.f32.partialorder %v2167_v24, 0.0  ;;  %v2642_v39 = vld [vmem:[#allocation4] ss:$0 sm:$0xff]  ;;  %vm2255_vm0 = vcmask 7168  }
 0x8ee   : > { %v2174_v44 = vand.u32 2147483647, %v2168_v17  ;;  %v2171_v18 = vsel %vm2169_vm14, 1.0, %v3385_v16  ;;  %vm2170_vm15 = vcmp.ge.f32.partialorder %v2168_v17, 0.0 }
 0x8ef   : > { %v2175_v43 = vmul.f32 0.3275911, %v2173_v42  ;;  %v2199_v54 = vsub.f32 0.0, %v2173_v42  ;;  %v2172_v23 = vsel %vm2170_vm15, 1.0, %v3385_v16 }
 0x8f0   : > { %v2176_v46 = vmul.f32 0.3275911, %v2174_v44  ;;  %v2200_v59 = vsub.f32 0.0, %v2174_v44 }
 0x8f1   : > { %2226 = vperm.xlu0 %2998, %v2218_v41   ;;  %v2177_v45 = vadd.f32 1.0, %v2175_v43  ;;  %v2201_v57 = vmul.f32 %v2199_v54, %v2173_v42 }
 0x8f2   : > { %v2178_v47 = vadd.f32 1.0, %v2176_v46  ;;  %v2202_v63 = vmul.f32 %v2200_v59, %v2174_v44 }
 0x8f3   : > { %2999 = vrcp.f32 %v2177_v45  ;;  %v2203_v61 = vmul.f32 1.442695, %v2201_v57 }
 0x8f4   : > { %3001 = vrcp.f32 %v2178_v47  ;;  %v2205_v2 = vmul.f32 1.442695, %v2202_v63 }
 0x8f5   : > { %3003 = vpow2.f32 %v2203_v61 }
 0x8f6   : > { %3005 = vpow2.f32 %v2205_v2 }
 0x900   : > { %v3000_v48 = vpop.eup %2999 }
 0x901   : > { %v2181_v49 = vmul.f32 1.0614054, %v3000_v48  ;;  %v3002_v50 = vpop.eup %3001 }
 0x902   : > { %v2182_v52 = vmul.f32 1.0614054, %v3002_v50  ;;  %v3004_v10 = vpop.eup %3003 }
 0x903   : > { %v2183_v51 = vadd.f32 -1.4531521, %v2181_v49  ;;  %v3006_v13 = vpop.eup %3005 }
 0x904   : > { %v2184_v55 = vadd.f32 -1.4531521, %v2182_v52 }
 0x905   : > { %v2185_v53 = vmul.f32 %v3000_v48, %v2183_v51 }
 0x906   : > { %v2186_v58 = vmul.f32 %v3002_v50, %v2184_v55 }
 0x907   : > { %v2187_v56 = vadd.f32 1.4214138, %v2185_v53 }
 0x908   : > { %v2188_v62 = vadd.f32 1.4214138, %v2186_v58 }
 0x909   : > { %v2189_v60 = vmul.f32 %v3000_v48, %v2187_v56 }
 0x90a   : > { %v2190_v1 = vmul.f32 %v3002_v50, %v2188_v62 }
 0x90b   : > { %v2191_v0 = vadd.f32 -0.28449672, %v2189_v60 }
 0x90c   : > { %v2192_v5 = vadd.f32 -0.28449672, %v2190_v1 }
 0x90d   : > { %v2193_v3 = vmul.f32 %v3000_v48, %v2191_v0 }
 0x90e   : > { %v2194_v7 = vmul.f32 %v3002_v50, %v2192_v5 }
 0x90f   : > { %v2195_v6 = vadd.f32 0.2548296, %v2193_v3 }
 0x910   : > { %v2196_v9 = vadd.f32 0.2548296, %v2194_v7 }
 0x911   : > { %v2197_v8 = vmul.f32 %v3000_v48, %v2195_v6 }
 0x912   : > { %v2198_v12 = vmul.f32 %v3002_v50, %v2196_v9 }
 0x913   : > { %v2207_v11 = vmul.f32 %v3004_v10, %v2197_v8 }
 0x914   : > { %v2208_v15 = vmul.f32 %v3006_v13, %v2198_v12 }
 0x915   : > { %v2209_v14 = vsub.f32 1.0, %v2207_v11 }
 0x916   : > { %v2210_v20 = vsub.f32 1.0, %v2208_v15 }
 0x917   : > { %v2211_v19 = vmul.f32 %v2209_v14, %v2171_v18 }
 0x918   : > { %v2212_v26 = vmul.f32 %v2210_v20, %v2172_v23 }
 0x919   : > { %v2213_v25 = vadd.f32 1.0, %v2211_v19 }
 0x91a   : > { %v2214_v28 = vadd.f32 1.0, %v2212_v26 }
 0x91b   : > { %v2215_v22 = vmul.f32 %v2213_v25, %v2165_v21 }
 0x91c   : > { %v2216_v32 = vmul.f32 %v2214_v28, %v2166_v27 }
 0x968   : > { %v2222_v29 = vpop.permute.xlu0 %2221 }
 0x969   : > { %v2229_v30 = vmul.f32 %v2222_v29, %v2215_v22 }
 0x96b   : > { %v2238_v33 = vmul.f32 %v2641_v31, %v2229_v30 }
 0x96c   : > { %v2227_v34 = vpop.permute.xlu0 %2226 }
 0x96d   : > { %v2230_v35 = vmul.f32 %v2227_v34, %v2216_v32  ;;  %v2240_v36 = vsel %vm1141_vm5, %v2238_v33, 0.0 }
 0x96e   : > { %2241 = vadd.xlane.f32.xlu1 %v2240_v36 }
 0x96f   : > { %v2239_v37 = vmul.f32 %v2641_v31, %v2230_v35 }
 0x971   : > { %v2243_v38 = vsel %vm1141_vm5, %v2239_v37, 0.0 }
 0x972   : > { %2244 = vadd.xlane.f32.xlu1 %v2243_v38 }
 0x9f7   : > { %v2242_v4 = vpop.xlane.xlu1 %2241 }
 0x9f8   : > { %v2253_v40 = vadd.f32 %v2642_v39, %v2242_v4 }
 0x9fa   : > { %2256 = vst.msk [vmem:[%s3780_s0] sm:$0xff] %vm2255_vm0, %v2253_v40 }
 0x9fb   : > { %v2245_v41 = vpop.xlane.xlu1 %2244 }
 0x9fc   : > { %v2254_v24 = vadd.f32 %v2642_v39, %v2245_v41 }
 0x9fe   : > { %2257 = vst.msk [vmem:[%s3780_s0 + $0x8] sm:$0xff] %vm2255_vm0, %v2254_v24 }
 0x9ff PF: > { %s4111_s4 = sld [smem:[#allocation26_spill]] }
 0xa00   : > { %s4112_s23 = sld [smem:[#allocation20_spill]] }
 0xa01   : > { %s4113_s24 = sld [smem:[#allocation21_spill]] }
 0xa02   : > { %s4114_s2 = sld [smem:[#allocation29_spill]] }
 0xa03   : > { %s4115_s25 = sld [smem:[#allocation24_spill]] }
 0xa04   : > { %s4116_s3 = sld [smem:[#allocation25_spill]] }
 0xa05   : > { %s34_s28 = sadd.s32 1, %s4111_s4   ;;  %s4117_s26 = sld [smem:[#allocation27_spill]] }
 0xa06   : > { %p31_p9 = scmp.ge.s32.totalorder %s34_s28, 6   ;;  %s4118_s27 = sld [smem:[#allocation28_spill]] }
 0xa08   :  { %33 = sbr.rel (!%p31_p9) target bundleno = 26 (0x1a), region = 257 }
 0xa0d   :  { %2279 = vsyncpa [#allocation6], 1 }
 0xa0e   :  { %2281 = vsyncpa [#allocation6 + $0x1], 1 }
 0xa0f   :  { %2282 = vsyncpa [#allocation8], 1 }

</bundles_post_ra>
